<compile_context>
chip_gen: v6e
topology: v6e:2x2x1
jax: 0.10.0
libtpu: 0.0.40
codegen_flags: <defaults>
</compile_context>

<pallas_src>
import functools

import jax
import jax.numpy as jnp
from jax import lax
from jax.experimental import pallas as pl
from jax.experimental.pallas import tpu as pltpu


def _round_up(x, m):
    return (x + m - 1) // m * m


def _pt_layer_kernel(qa_ref, nbr_ref,
                     w1_ref, b1_ref, wc_ref, bc_ref, a2_ref, ab2_ref,
                     out_ref, *, K, D, Dh, RELC, RC, FOLD):
    TR = qa_ref.shape[0]
    nchunks = TR // RC
    OR = RC // FOLD                     # output rows written per chunk (row-folded)

    def chunk(c, carry):
        r0 = pl.multiple_of(c * RC, RC)
        n0 = pl.multiple_of(c * (RC * K), RC * K)

        # one dense bf16 slab per (point, neighbor): [rel | k@a1 | v]
        nbr = nbr_ref[pl.ds(n0, RC * K), :]                      # (RC*K, C) bf16
        rel = nbr[:, :RELC]                                      # (RC*K, RELC)
        ka = nbr[:, RELC:RELC + Dh]                              # (RC*K, Dh)
        vv = nbr[:, RELC + Dh:RELC + Dh + D]                     # (RC*K, D)

        # pos_mlp layer 1 on the MXU (rel padded to RELC channels, bf16 operands)
        h1 = jnp.dot(rel, w1_ref[...], preferred_element_type=jnp.float32)
        h1 = jnp.maximum(h1 + b1_ref[...], 0.0).astype(jnp.bfloat16)   # (RC*K, H)

        # fused pos_mlp layer 2 + (rel_pos_emb @ a1) in a single wide matmul
        comb = jnp.dot(h1, wc_ref[...], preferred_element_type=jnp.float32)
        comb = comb + bc_ref[...]                                # (RC*K, CW) f32
        pe_a1 = comb[:, :Dh]                                     # rel_pos_emb @ a1
        pe = comb[:, Dh:Dh + D]                                  # rel_pos_emb (+ b2)

        # attention branch: attn_mlp layer 1 pre-folded into qa / ka on the host
        qa = qa_ref[pl.ds(r0, RC), :]                            # (RC, Dh) f32
        qa_rep = jnp.broadcast_to(qa[:, None, :], (RC, K, Dh)).reshape(RC * K, Dh)
        s1 = jnp.maximum(qa_rep - ka.astype(jnp.float32) + pe_a1, 0.0)
        s1 = s1.astype(jnp.bfloat16)
        sim = jnp.dot(s1, a2_ref[...], preferred_element_type=jnp.float32)
        sim = (sim + ab2_ref[...]).reshape(RC, K, D)             # (RC, K, D)

        # value branch
        vpe = (vv.astype(jnp.float32) + pe).reshape(RC, K, D)    # (RC, K, D)

        # softmax over the neighbor axis (dim=-2 in the PyTorch code);
        # normalization folded into aggregation, divide on the EUP slot.
        m = jnp.max(sim, axis=1, keepdims=True)
        e = jnp.exp(sim - m)
        num = jnp.sum(e * vpe, axis=1)                           # (RC, D)
        den = jnp.sum(e, axis=1)                                 # (RC, D)
        res = num * pl.reciprocal(den, approx=True)              # (RC, D)

        # lane-dense store: pack FOLD consecutive point rows into one wide row
        # (built with slice + lane-concat only; no minor-dim reshape needed).
        if FOLD > 1:
            res3 = res.reshape(OR, FOLD, D)
            packed = jnp.concatenate([res3[:, f, :] for f in range(FOLD)], axis=-1)
        else:
            packed = res
        o0 = pl.multiple_of(c * OR, OR)
        out_ref[pl.ds(o0, OR), :] = packed
        return carry

    lax.fori_loop(0, nchunks, chunk, 0, unroll=True)


def point_transformer_layer(x, pos, params, num_neighbors, *, row_tile=256):
    """x: (B, N, 3) features, pos: (B, N, 3) coordinates.  Returns (B, N, D) f32.

    row_tile=256 is safe on all generations (fits v7x's 64 MiB VMEM and keeps
    >=2 grid steps for its two TensorCores at realistic point counts);
    on v6e it can be raised to 512-1024 together with vmem_limit_bytes.
    """
    f32 = jnp.float32
    B, N, _ = x.shape
    D = params["w2"].shape[1]          # emb_dims
    Dh = params["a1"].shape[1]         # emb_dims * heads
    H = params["w1"].shape[1]          # pos_mlp hidden
    RELC = 32                          # rel-pos channels padded 3 -> 32 (lane-dense)

    # ---- to_qkv (no bias) and algebraic pre-projections (tiny host matmuls) ----
    qkv = x @ params["wqkv"]                                    # (B, N, 3D)
    q, k, v = jnp.split(qkv, 3, axis=-1)
    qa = q @ params["a1"] + params["ab1"] + params["b2"] @ params["a1"]   # (B,N,Dh)
    ka = k @ params["a1"]                                                  # (B,N,Dh)

    # ---- neighbor selection + gather ----
    # TODO(synk): top-k + batched gather stay in JAX; an in-kernel DMA gather
    # (scalar-prefetched idx + make_async_copy from compact HBM tables) would
    # avoid the (BN,K,·) HBM round trip, but per-neighbor 64-128 B DMAs need
    # page/sort-level batching to beat XLA's gather, so it is not done here.
    K = num_neighbors
    if K < N:
        rel_all = pos[:, :, None, :] - pos[:, None, :, :]
        rel_dist = jnp.linalg.norm(rel_all, axis=-1)            # (B, N, N)
        _, idx = jax.lax.top_k(-rel_dist, K)                    # (B, N, K)
    else:
        K = N
        idx = jnp.broadcast_to(jnp.arange(N)[None, None, :], (B, N, N))

    gather = jax.vmap(lambda arr, ib: arr[ib])                  # per-batch gather
    ka_sel = gather(ka.astype(jnp.bfloat16), idx)               # (B,N,K,Dh) bf16
    v_sel = gather(v.astype(jnp.bfloat16), idx)                 # (B,N,K,D)  bf16
    pos_sel = gather(pos, idx)                                  # (B,N,K,3)  f32
    rel_sel = pos[:, :, None, :] - pos_sel                      # (B,N,K,3)
    rel32 = jnp.pad(rel_sel, ((0, 0), (0, 0), (0, 0), (0, RELC - 3)))
    rel32 = rel32.astype(jnp.bfloat16)

    # one combined per-neighbor slab: every DMA row is dense, no minor-dim padding
    nbr = jnp.concatenate([rel32, ka_sel, v_sel], axis=-1)      # (B,N,K,C) bf16
    C = RELC + Dh + D

    BN = B * N
    qaf = qa.reshape(BN, Dh).astype(f32)
    nbrf = nbr.reshape(BN * K, C)

    # ---- row tiling (TR always a multiple of 32; processed in 32-row chunks) ----
    if BN >= 64:
        TR = max(64, _round_up(min(row_tile, _round_up(BN, 64)), 64))
    else:
        TR = _round_up(max(BN, 1), 32)
    RC = min(32, TR)
    padded = _round_up(BN, TR)
    if BN >= 128 and padded // TR < 2:
        TR //= 2                       # keep >=2 grid steps (v7x has 2 TensorCores)
        padded = _round_up(BN, TR)
    if padded != BN:
        pad = padded - BN
        qaf = jnp.pad(qaf, ((0, pad), (0, 0)))
        nbrf = jnp.pad(nbrf, ((0, pad * K), (0, 0)))
    grid = (padded // TR,)

    # lane-dense output: fold FOLD consecutive point rows into one wide row
    FOLD = min(128 // D, 4) if (D < 128 and 128 % D == 0) else 1
    OUT_W = FOLD * D

    # ---- weight preprocessing: pad / fuse so in-kernel matmuls are wide & bf16 ----
    w1p = jnp.zeros((RELC, H), f32).at[:3, :].set(params["w1"]).astype(jnp.bfloat16)
    b1 = params["b1"].astype(f32)                               # (1, H)
    w2a1 = params["w2"] @ params["a1"]                          # (H, Dh)
    CW = _round_up(Dh + D, 128)
    wc = jnp.zeros((H, CW), f32)
    wc = wc.at[:, :Dh].set(w2a1).at[:, Dh:Dh + D].set(params["w2"])
    wc = wc.astype(jnp.bfloat16)
    bc = jnp.zeros((1, CW), f32).at[:, Dh:Dh + D].set(params["b2"])
    a2 = params["a2"].astype(jnp.bfloat16)                      # (Dh, D)
    ab2 = params["ab2"].astype(f32)                             # (1, D)

    kernel = functools.partial(_pt_layer_kernel, K=K, D=D, Dh=Dh,
                               RELC=RELC, RC=RC, FOLD=FOLD)

    in_specs = [
        pl.BlockSpec((TR, Dh), lambda r: (r, 0)),               # qa   (f32)
        pl.BlockSpec((TR * K, C), lambda r: (r, 0)),            # nbr  (bf16, dense)
        pl.BlockSpec((RELC, H), lambda r: (0, 0)),              # w1 padded
        pl.BlockSpec((1, H), lambda r: (0, 0)),                 # b1
        pl.BlockSpec((H, CW), lambda r: (0, 0)),                # [w2@a1 | w2 | 0]
        pl.BlockSpec((1, CW), lambda r: (0, 0)),                # [0 | b2 | 0]
        pl.BlockSpec((Dh, D), lambda r: (0, 0)),                # a2
        pl.BlockSpec((1, D), lambda r: (0, 0)),                 # ab2
    ]

    out = pl.pallas_call(
        kernel,
        out_shape=jax.ShapeDtypeStruct((padded // FOLD, OUT_W), f32),
        grid=grid,
        in_specs=in_specs,
        out_specs=pl.BlockSpec((TR // FOLD, OUT_W), lambda r: (r, 0)),
        compiler_params=pltpu.CompilerParams(
            dimension_semantics=("parallel",),
            vmem_limit_bytes=32 * 1024 * 1024),
    )(qaf, nbrf, w1p, b1, wc, bc, a2, ab2)

    return out.reshape(padded, D)[:BN].reshape(B, N, D)


def reference_jax(x, pos, params, num_neighbors):
    """Pure-JAX f32 reference mirroring the PyTorch forward."""
    B, N, _ = x.shape
    D = params["w2"].shape[1]
    qkv = x @ params["wqkv"]
    q, k, v = jnp.split(qkv, 3, axis=-1)
    rel_pos = pos[:, :, None, :] - pos[:, None, :, :]
    rel_pos_emb = (jnp.maximum(rel_pos @ params["w1"] + params["b1"], 0.0)
                   @ params["w2"] + params["b2"])
    qk_rel = q[:, :, None, :] - k[:, None, :, :]
    v_rep = jnp.broadcast_to(v[:, None, :, :], (B, N, N, D))
    if num_neighbors < N:
        rel_dist = jnp.linalg.norm(rel_pos, axis=-1)
        _, idx = jax.lax.top_k(-rel_dist, num_neighbors)
        take = lambda t: jnp.take_along_axis(t, idx[..., None], axis=2)
        v_rep, qk_rel, rel_pos_emb = take(v_rep), take(qk_rel), take(rel_pos_emb)
    v_rep = v_rep + rel_pos_emb
    sim_in = qk_rel + rel_pos_emb
    sim = (jnp.maximum(sim_in @ params["a1"] + params["ab1"], 0.0)
           @ params["a2"] + params["ab2"])
    attn = jax.nn.softmax(sim, axis=-2)
    return jnp.einsum("bijd,bijd->bid", attn, v_rep)


def make_params(key, d_model=3, emb_dims=32, heads=2, pos_mlp_hidden=64):
    D, H = emb_dims, pos_mlp_hidden
    ks = jax.random.split(key, 9)
    n = lambda k, shape, scale: (jax.random.normal(k, shape, jnp.float32) * scale)
    return {
        "wqkv": n(ks[0], (d_model, 3 * D), 0.3),
        "w1": n(ks[1], (3, H), 0.3),
        "b1": n(ks[2], (1, H), 0.1),
        "w2": n(ks[3], (H, D), 0.1),
        "b2": n(ks[4], (1, D), 0.1),
        "a1": n(ks[5], (D, D * heads), 0.1),
        "ab1": n(ks[6], (1, D * heads), 0.1),
        "a2": n(ks[7], (D * heads, D), 0.1),
        "ab2": n(ks[8], (1, D), 0.1),
    }


if __name__ == "__main__":
    B, N, K = 2, 16, 8                 # batch, points, num_neighbors
    D_MODEL, EMB, HEADS = 3, 32, 2

    key = jax.random.PRNGKey(0)
    kx, kp, kw = jax.random.split(key, 3)
    x = jax.random.normal(kx, (B, N, D_MODEL), jnp.float32)
    pos = jax.random.normal(kp, (B, N, 3), jnp.float32)
    params = make_params(kw, d_model=D_MODEL, emb_dims=EMB, heads=HEADS)

    out = point_transformer_layer(x, pos, params, num_neighbors=K)
    out = jax.block_until_ready(out)

    ref = jax.block_until_ready(reference_jax(x, pos, params, num_neighbors=K))
    assert out.shape == (B, N, EMB)
    max_err = float(jnp.max(jnp.abs(out - ref)))
    # bf16 streamed operands + bf16 MXU matmuls + approx reciprocal -> loose tol
    assert jnp.allclose(out, ref, rtol=3e-2, atol=3e-2), max_err

    print("KERNEL_OK")
</pallas_src>

<mosaic_0001>
module attributes {stable_mosaic.version = 11 : i64} {
  func.func @_pt_layer_kernel(%arg0: i32, %arg1: memref<32x64xf32, #tpu.memory_space<vmem>>, %arg2: memref<256x128xbf16, #tpu.memory_space<vmem>>, %arg3: memref<32x64xbf16, #tpu.memory_space<vmem>>, %arg4: memref<1x64xf32, #tpu.memory_space<vmem>>, %arg5: memref<64x128xbf16, #tpu.memory_space<vmem>>, %arg6: memref<1x128xf32, #tpu.memory_space<vmem>>, %arg7: memref<64x32xbf16, #tpu.memory_space<vmem>>, %arg8: memref<1x32xf32, #tpu.memory_space<vmem>>, %arg9: memref<8x128xf32, #tpu.memory_space<vmem>>) attributes {dimension_semantics = [#tpu.dimension_semantics<parallel>], iteration_bounds = array<i64: 1>, scalar_prefetch = 0 : i64, scratch_operands = 0 : i64, tpu.core_type = #tpu.core_type<tc>, window_params = [{transform_indices = @transform_0, window_bounds = array<i64: 32, 64>}, {transform_indices = @transform_1, window_bounds = array<i64: 256, 128>}, {pipeline_mode = #tpu.pipeline_mode<synchronous>, transform_indices = @transform_2, window_bounds = array<i64: 32, 64>}, {pipeline_mode = #tpu.pipeline_mode<synchronous>, transform_indices = @transform_3, window_bounds = array<i64: 1, 64>}, {pipeline_mode = #tpu.pipeline_mode<synchronous>, transform_indices = @transform_4, window_bounds = array<i64: 64, 128>}, {pipeline_mode = #tpu.pipeline_mode<synchronous>, transform_indices = @transform_5, window_bounds = array<i64: 1, 128>}, {pipeline_mode = #tpu.pipeline_mode<synchronous>, transform_indices = @transform_6, window_bounds = array<i64: 64, 32>}, {pipeline_mode = #tpu.pipeline_mode<synchronous>, transform_indices = @transform_7, window_bounds = array<i64: 1, 32>}, {transform_indices = @transform_8, window_bounds = array<i64: 8, 128>}]} {
    %c0_i32 = arith.constant 0 : i32
    %c32_i32 = arith.constant 32 : i32
    %0 = arith.muli %c0_i32, %c32_i32 : i32
    %1 = tpu.assume_multiple %0, 32 : i32
    %c256_i32 = arith.constant 256 : i32
    %2 = arith.muli %c0_i32, %c256_i32 : i32
    %3 = tpu.assume_multiple %2, 256 : i32
    %4 = arith.index_cast %3 : i32 to index
    %c0 = arith.constant 0 : index
    %5 = vector.load %arg2[%4, %c0] : memref<256x128xbf16, #tpu.memory_space<vmem>>, vector<256x128xbf16>
    %6 = vector.extract_strided_slice %5 {offsets = [0, 0], sizes = [256, 32], strides = [1, 1]} : vector<256x128xbf16> to vector<256x32xbf16>
    %7 = vector.extract_strided_slice %5 {offsets = [0, 32], sizes = [256, 64], strides = [1, 1]} : vector<256x128xbf16> to vector<256x64xbf16>
    %8 = vector.extract_strided_slice %5 {offsets = [0, 96], sizes = [256, 32], strides = [1, 1]} : vector<256x128xbf16> to vector<256x32xbf16>
    %c0_0 = arith.constant 0 : index
    %c0_1 = arith.constant 0 : index
    %9 = vector.load %arg3[%c0_0, %c0_1] : memref<32x64xbf16, #tpu.memory_space<vmem>>, vector<32x64xbf16>
    %cst = arith.constant dense<0.000000e+00> : vector<256x64xf32>
    %10 = tpu.matmul %6, %9, %cst {dimension_numbers = #tpu.dot_dimension_numbers<[1], [0], [0], [1], [0, 0, 1, 1], [], []>} : vector<256x32xbf16>, vector<32x64xbf16>, vector<256x64xf32> -> vector<256x64xf32>
    %c0_2 = arith.constant 0 : index
    %c0_3 = arith.constant 0 : index
    %11 = vector.load %arg4[%c0_2, %c0_3] : memref<1x64xf32, #tpu.memory_space<vmem>>, vector<1x64xf32>
    %12 = vector.broadcast %11 : vector<1x64xf32> to vector<256x64xf32>
    %13 = arith.addf %10, %12 : vector<256x64xf32>
    %cst_4 = arith.constant 0.000000e+00 : f32
    %14 = vector.broadcast %cst_4 : f32 to vector<256x64xf32>
    %15 = arith.maximumf %13, %14 : vector<256x64xf32>
    %16 = arith.truncf %15 : vector<256x64xf32> to vector<256x64xbf16>
    %c0_5 = arith.constant 0 : index
    %c0_6 = arith.constant 0 : index
    %17 = vector.load %arg5[%c0_5, %c0_6] : memref<64x128xbf16, #tpu.memory_space<vmem>>, vector<64x128xbf16>
    %cst_7 = arith.constant dense<0.000000e+00> : vector<256x128xf32>
    %18 = tpu.matmul %16, %17, %cst_7 {dimension_numbers = #tpu.dot_dimension_numbers<[1], [0], [0], [1], [0, 0, 1, 1], [], []>} : vector<256x64xbf16>, vector<64x128xbf16>, vector<256x128xf32> -> vector<256x128xf32>
    %c0_8 = arith.constant 0 : index
    %c0_9 = arith.constant 0 : index
    %19 = vector.load %arg6[%c0_8, %c0_9] : memref<1x128xf32, #tpu.memory_space<vmem>>, vector<1x128xf32>
    %20 = vector.broadcast %19 : vector<1x128xf32> to vector<256x128xf32>
    %21 = arith.addf %18, %20 : vector<256x128xf32>
    %22 = vector.extract_strided_slice %21 {offsets = [0, 0], sizes = [256, 64], strides = [1, 1]} : vector<256x128xf32> to vector<256x64xf32>
    %23 = vector.extract_strided_slice %21 {offsets = [0, 64], sizes = [256, 32], strides = [1, 1]} : vector<256x128xf32> to vector<256x32xf32>
    %24 = arith.index_cast %1 : i32 to index
    %c0_10 = arith.constant 0 : index
    %25 = vector.load %arg1[%24, %c0_10] : memref<32x64xf32, #tpu.memory_space<vmem>>, vector<32x64xf32>
    %26 = vector.shape_cast %25 : vector<32x64xf32> to vector<32x1x64xf32>
    %27 = vector.shape_cast %26 : vector<32x1x64xf32> to vector<32x1x64xf32>
    %28 = vector.broadcast %27 : vector<32x1x64xf32> to vector<32x8x64xf32>
    %29 = vector.shape_cast %28 : vector<32x8x64xf32> to vector<256x64xf32>
    %30 = arith.extf %7 : vector<256x64xbf16> to vector<256x64xf32>
    %31 = arith.subf %29, %30 : vector<256x64xf32>
    %32 = arith.addf %31, %22 : vector<256x64xf32>
    %cst_11 = arith.constant 0.000000e+00 : f32
    %33 = vector.broadcast %cst_11 : f32 to vector<256x64xf32>
    %34 = arith.maximumf %32, %33 : vector<256x64xf32>
    %35 = arith.truncf %34 : vector<256x64xf32> to vector<256x64xbf16>
    %c0_12 = arith.constant 0 : index
    %c0_13 = arith.constant 0 : index
    %36 = vector.load %arg7[%c0_12, %c0_13] : memref<64x32xbf16, #tpu.memory_space<vmem>>, vector<64x32xbf16>
    %cst_14 = arith.constant dense<0.000000e+00> : vector<256x32xf32>
    %37 = tpu.matmul %35, %36, %cst_14 {dimension_numbers = #tpu.dot_dimension_numbers<[1], [0], [0], [1], [0, 0, 1, 1], [], []>} : vector<256x64xbf16>, vector<64x32xbf16>, vector<256x32xf32> -> vector<256x32xf32>
    %c0_15 = arith.constant 0 : index
    %c0_16 = arith.constant 0 : index
    %38 = vector.load %arg8[%c0_15, %c0_16] : memref<1x32xf32, #tpu.memory_space<vmem>>, vector<1x32xf32>
    %39 = vector.broadcast %38 : vector<1x32xf32> to vector<256x32xf32>
    %40 = arith.addf %37, %39 : vector<256x32xf32>
    %41 = vector.shape_cast %40 : vector<256x32xf32> to vector<32x8x32xf32>
    %42 = arith.extf %8 : vector<256x32xbf16> to vector<256x32xf32>
    %43 = arith.addf %42, %23 : vector<256x32xf32>
    %44 = vector.shape_cast %43 : vector<256x32xf32> to vector<32x8x32xf32>
    %cst_17 = arith.constant dense<0xFF800000> : vector<32x32xf32>
    %45 = vector.multi_reduction <maximumf>, %41, %cst_17 [1] : vector<32x8x32xf32> to vector<32x32xf32>
    %46 = vector.shape_cast %45 : vector<32x32xf32> to vector<32x1x32xf32>
    %47 = vector.broadcast %46 : vector<32x1x32xf32> to vector<32x8x32xf32>
    %48 = arith.subf %41, %47 : vector<32x8x32xf32>
    %49 = math.exp %48 : vector<32x8x32xf32>
    %50 = arith.mulf %49, %44 : vector<32x8x32xf32>
    %cst_18 = arith.constant dense<0.000000e+00> : vector<32x32xf32>
    %51 = vector.multi_reduction <add>, %50, %cst_18 [1] : vector<32x8x32xf32> to vector<32x32xf32>
    %cst_19 = arith.constant dense<0.000000e+00> : vector<32x32xf32>
    %52 = vector.multi_reduction <add>, %49, %cst_19 [1] : vector<32x8x32xf32> to vector<32x32xf32>
    %53 = tpu.reciprocal %52 {approx = true} : vector<32x32xf32> -> vector<32x32xf32>
    %54 = arith.mulf %51, %53 : vector<32x32xf32>
    %55 = vector.shape_cast %54 : vector<32x32xf32> to vector<8x4x32xf32>
    %56 = vector.extract_strided_slice %55 {offsets = [0, 0, 0], sizes = [8, 1, 32], strides = [1, 1, 1]} : vector<8x4x32xf32> to vector<8x1x32xf32>
    %57 = vector.shape_cast %56 : vector<8x1x32xf32> to vector<8x32xf32>
    %58 = vector.extract_strided_slice %55 {offsets = [0, 1, 0], sizes = [8, 1, 32], strides = [1, 1, 1]} : vector<8x4x32xf32> to vector<8x1x32xf32>
    %59 = vector.shape_cast %58 : vector<8x1x32xf32> to vector<8x32xf32>
    %60 = vector.extract_strided_slice %55 {offsets = [0, 2, 0], sizes = [8, 1, 32], strides = [1, 1, 1]} : vector<8x4x32xf32> to vector<8x1x32xf32>
    %61 = vector.shape_cast %60 : vector<8x1x32xf32> to vector<8x32xf32>
    %62 = vector.extract_strided_slice %55 {offsets = [0, 3, 0], sizes = [8, 1, 32], strides = [1, 1, 1]} : vector<8x4x32xf32> to vector<8x1x32xf32>
    %63 = vector.shape_cast %62 : vector<8x1x32xf32> to vector<8x32xf32>
    %64 = tpu.concatenate %57, %59, %61, %63 in 1 : vector<8x32xf32>, vector<8x32xf32>, vector<8x32xf32>, vector<8x32xf32> -> vector<8x128xf32>
    %c8_i32 = arith.constant 8 : i32
    %65 = arith.muli %c0_i32, %c8_i32 : i32
    %66 = tpu.assume_multiple %65, 8 : i32
    %67 = arith.index_cast %66 : i32 to index
    %c0_20 = arith.constant 0 : index
    %68 = vector.load %arg9[%67, %c0_20] : memref<8x128xf32, #tpu.memory_space<vmem>>, vector<8x128xf32>
    tpu.vector_store %arg9[%67, %c0_20], %64 {strides = array<i32>} : memref<8x128xf32, #tpu.memory_space<vmem>>, vector<8x128xf32>,
    %c1_i32 = arith.constant 1 : i32
    return
  }
  func.func @transform_0(%arg0: i32) -> (i32, i32) {
    %c0_i32 = arith.constant 0 : i32
    %c0_i32_0 = arith.constant 0 : i32
    return %arg0, %c0_i32 : i32, i32
  }
  func.func @transform_1(%arg0: i32) -> (i32, i32) {
    %c0_i32 = arith.constant 0 : i32
    %c0_i32_0 = arith.constant 0 : i32
    return %arg0, %c0_i32 : i32, i32
  }
  func.func @transform_2(%arg0: i32) -> (i32, i32) {
    %c0_i32 = arith.constant 0 : i32
    %c0_i32_0 = arith.constant 0 : i32
    %c0_i32_1 = arith.constant 0 : i32
    return %c0_i32, %c0_i32_0 : i32, i32
  }
  func.func @transform_3(%arg0: i32) -> (i32, i32) {
    %c0_i32 = arith.constant 0 : i32
    %c0_i32_0 = arith.constant 0 : i32
    %c0_i32_1 = arith.constant 0 : i32
    return %c0_i32, %c0_i32_0 : i32, i32
  }
  func.func @transform_4(%arg0: i32) -> (i32, i32) {
    %c0_i32 = arith.constant 0 : i32
    %c0_i32_0 = arith.constant 0 : i32
    %c0_i32_1 = arith.constant 0 : i32
    return %c0_i32, %c0_i32_0 : i32, i32
  }
  func.func @transform_5(%arg0: i32) -> (i32, i32) {
    %c0_i32 = arith.constant 0 : i32
    %c0_i32_0 = arith.constant 0 : i32
    %c0_i32_1 = arith.constant 0 : i32
    return %c0_i32, %c0_i32_0 : i32, i32
  }
  func.func @transform_6(%arg0: i32) -> (i32, i32) {
    %c0_i32 = arith.constant 0 : i32
    %c0_i32_0 = arith.constant 0 : i32
    %c0_i32_1 = arith.constant 0 : i32
    return %c0_i32, %c0_i32_0 : i32, i32
  }
  func.func @transform_7(%arg0: i32) -> (i32, i32) {
    %c0_i32 = arith.constant 0 : i32
    %c0_i32_0 = arith.constant 0 : i32
    %c0_i32_1 = arith.constant 0 : i32
    return %c0_i32, %c0_i32_0 : i32, i32
  }
  func.func @transform_8(%arg0: i32) -> (i32, i32) {
    %c0_i32 = arith.constant 0 : i32
    %c0_i32_0 = arith.constant 0 : i32
    return %arg0, %c0_i32 : i32, i32
  }
}

</mosaic_0001>

<bundles_post_ra>
// kernel: tpu_custom_call.1
= control target key start
LH: loop header
LB: loop body
LE: loop exit
PB: predicated region body
PF: predicated region fallthrough
CT: control target
= control target key end

     0   :  { %13 = vsyncpa [#allocation3], 0  ;;  %s4718_s0 = inlined_call_operand.vmem [shape: f32[32,64], index: 0, kind: input, shape index: {}]   ;;  %s4719_s1 = inlined_call_operand.hbm [shape: bf16[256,128], index: 1, kind: input, shape index: {}]   ;;  %s4720_s2 = inlined_call_operand.vmem [shape: bf16[32,64], index: 2, kind: input, shape index: {}]   ;;  %s4721_s3 = inlined_call_operand.vmem [shape: f32[1,64], index: 3, kind: input, shape index: {}]   ;;  %s4722_s4 = inlined_call_operand.hbm [shape: bf16[64,128], index: 4, kind: input, shape index: {}]   ;;  %s4723_s5 = inlined_call_operand.vmem [shape: f32[1,128], index: 5, kind: input, shape index: {}]   ;;  %s4724_s6 = inlined_call_operand.vmem [shape: bf16[64,32], index: 6, kind: input, shape index: {}]   ;;  %s4725_s7 = inlined_call_operand.vmem [shape: f32[1,32], index: 7, kind: input, shape index: {}]   ;;  %s4726_s8 = inlined_call_operand.hbm [shape: f32[8,128], index: 8, kind: output, shape index: {}]  }
   0x1   :  { %14 = vsyncpa [#allocation6], 0 }
   0x2   :  { %15 = vsyncpa [#allocation4], 0  ;;  %s3419_s27 = smov [#allocation2]  }
   0x3   :  { %s23_s28 = sshll.u32 %s3419_s27, 4  ;;  %s24_s28 = int_to_ptr.vmem [resolvable:$true] %s23_s28 }
   0x4   :  { %s3361_s29 = scalar_lea.vmem %s24_s28, 2048  ;;  %p3366_p1 = scmp.lt.s32.totalorder %s24_s28, %s24_s28 }
   0x5   :  { %p3362_p0 = scmp.ne.s32.totalorder %s24_s28, %s3361_s29  ;;  %p3367_p2 = scmp.lt.s32.totalorder %s3361_s29, %s3361_s29 }
   0x7   :  { %p3368_p3 = por %p3367_p2, %p3366_p1 }
   0x9   :  { %p3369_p4 = pnand %p3368_p3, %p3362_p0 }
   0xb   :  { %3372 = shalt.err (!%p3369_p4)
}
   0xc   :  { %s3420_s30 = smov 64   ;;  %s3421_s9 = smov 4  }
   0xd   :  { %29 = dma.hbm_to_vmem [thread:$0]  %s4719_s1, 2048, %s24_s28, [#allocation3], %s3420_s30, %s3420_s30, %s3421_s9  }
   0xe   :  { %s3422_s12 = smov [#allocation5]  }
   0xf   :  { %s39_s13 = sshll.u32 %s3422_s12, 4  ;;  %s40_s13 = int_to_ptr.vmem [resolvable:$true] %s39_s13 }
  0x10   :  { %s3381_s14 = scalar_lea.vmem %s40_s13, 512  ;;  %p3386_p6 = scmp.lt.s32.totalorder %s40_s13, %s40_s13 }
  0x11   :  { %p3382_p5 = scmp.ne.s32.totalorder %s40_s13, %s3381_s14  ;;  %p3387_p7 = scmp.lt.s32.totalorder %s3381_s14, %s3381_s14 }
  0x13   :  { %p3388_p8 = por %p3387_p7, %p3386_p6 }
  0x15   :  { %p3389_p9 = pnand %p3388_p8, %p3382_p5 }
  0x17   :  { %3392 = shalt.err (!%p3389_p9)
}
  0x18   :  { %45 = dma.hbm_to_vmem [thread:$0]  %s4722_s4, 512, %s40_s13, [#allocation6], %s3420_s30, %s3420_s30, %s3421_s9  }
  0x19   :  { %3413 = dma.done.wait [#allocation3], 2048  }
  0x1a   :  { %3414 = vsyncadd [#allocation3], 4294965248 }
  0x1b   :  { %3415 = dma.done.wait [#allocation6], 512  }
  0x1c   :  { %3416 = vsyncadd [#allocation6], 4294966784  ;;  %v3178_v0 = vld [vmem:[%s4720_s2 + $0x8] sm:$0xff]   ;;  %v3179_v1 = vld [vmem:[%s4720_s2] sm:$0xff]   ;;  %vm194_vm0 = vcmask 261120   ;;  %s3423_s22 = smov 96  }
  0x1d   :  { %2970 = vmatprep.subr.bf16.mxu0 %v3178_v0  ;;  %v3488_v2 = vld [vmem:[#allocation2] sm:$0xff]   ;;  %3086 = vmatprep.subr.bf16.mxu1 %v3178_v0  ;;  %v3490_v3 = vld [vmem:[#allocation2 + $0x8] sm:$0xff]   ;;  %v3492_v4 = vld [vmem:[#allocation2 + $0x10] sm:$0xff]   ;;  %vm491_vm1 = vcmask 523264   ;;  %vm2745_vm2 = vcmask 1041409   ;;  %vm2747_vm3 = vcmask 1042434  }
  0x1e   :  { %2971 = vmatpush3.bf16.msra.mxu0 %v3178_v0  ;;  %3088 = vmatpush3.bf16.msra.mxu1 %v3178_v0  ;;  %v3494_v5 = vld [vmem:[#allocation2 + $0x40] sm:$0xff]   ;;  %v3498_v6 = vld [vmem:[#allocation2 + $0x48] sm:$0xff]   ;;  %v3500_v7 = vld [vmem:[#allocation2 + $0x50] sm:$0xff]   ;;  %v4732_v22 = vunpack.c.l.bf16 %v3488_v2  ;;  %v1066_v23 = vunpack.c.h.bf16 %v3488_v2  ;;  %v1067_v24 = vunpack.c.l.bf16 %v3490_v3  ;;  %v1068_v25 = vunpack.c.h.bf16 %v3490_v3 }
  0x1f   :  { %2972 = vmatprep.subr.bf16.mxu0 %v3179_v1  ;;  %3087 = vmatprep.subr.bf16.mxu1 %v3179_v1  ;;  %v3196_v8 = vld [vmem:[#allocation5 + $0x18] sm:$0xff]   ;;  %v3510_v11 = vld [vmem:[#allocation2 + $0x20] sm:$0xff]   ;;  %v3197_v13 = vld [vmem:[#allocation5 + $0x10] sm:$0xff]   ;;  %v4735_v28 = vunpack.c.l.bf16 %v3492_v4  ;;  %v1070_v29 = vunpack.c.h.bf16 %v3492_v4  ;;  %v4730_v47 = vunpack.c.l.bf16 %v3494_v5  ;;  %v4744_v48 = vunpack.c.h.bf16 %v3494_v5 }
  0x20   :  { %2974 = vmatprep.mubr.msk.bf16.mxu0 %vm194_vm0, %v3488_v2  ;;  %2990 = vmatprep.mubr.msk.bf16.mxu1 %vm194_vm0, %v3494_v5  ;;  %v3504_v9 = vld [vmem:[#allocation2 + $0x18] sm:$0xff]   ;;  %v3514_v12 = vld [vmem:[#allocation2 + $0x60] sm:$0xff]   ;;  %v3198_v14 = vld [vmem:[#allocation5 + $0x8] sm:$0xff]   ;;  %v3098_v32 = vpack.i.bf16 %v1066_v23, %v4732_v22  ;;  %v3103_v34 = vpack.i.bf16 %v1068_v25, %v1067_v24  ;;  %v4731_v35 = vunpack.c.l.bf16 %v3510_v11  ;;  %v4750_v36 = vunpack.c.h.bf16 %v3510_v11 }
  0x21   :  { %v3506_v10 = vld [vmem:[#allocation2 + $0x58] sm:$0xff]   ;;  %v3526_v15 = vld [vmem:[#allocation2 + $0x28] sm:$0xff]   ;;  %v3532_v17 = vld [vmem:[#allocation2 + $0x30] sm:$0xff]   ;;  %v1071_v30 = vunpack.c.l.bf16 %v3504_v9  ;;  %v1072_v31 = vunpack.c.h.bf16 %v3504_v9  ;;  %v3108_v33 = vpack.i.bf16 %v1070_v29, %v4735_v28  ;;  %v4747_v51 = vunpack.c.l.bf16 %v3498_v6 }
  0x22   :  { %2973 = vmatpush3.bf16.msra.mxu0 %v3179_v1  ;;  %3089 = vmatpush3.bf16.msra.mxu1 %v3179_v1  ;;  %v3530_v16 = vld [vmem:[#allocation2 + $0x68] sm:$0xff]   ;;  %v3534_v18 = vld [vmem:[#allocation2 + $0x70] sm:$0xff]   ;;  %v3542_v19 = vld [vmem:[#allocation2 + $0x38] sm:$0xff]   ;;  %v1075_v39 = vunpack.c.l.bf16 %v3526_v15  ;;  %v4751_v40 = vunpack.c.h.bf16 %v3526_v15  ;;  %v3118_v41 = vpack.i.bf16 %v4750_v36, %v4731_v35  ;;  %v4733_v42 = vunpack.c.l.bf16 %v3532_v17 }
  0x23   :  { %3006 = vmatprep.subr.bf16.mxu1 %v3196_v8  ;;  %v3546_v20 = vld [vmem:[#allocation2 + $0x78] sm:$0xff]   ;;  %v3199_v21 = vld [vmem:[#allocation5] sm:$0xff]   ;;  %v3201_v27 = vld [vmem:[%s4724_s6 + $0x10] sm:$0xff]   ;;  %3099 = vrot.lane.b32.xlu0 %v3098_v32, %s3423_s22  ;;  %v3113_v38 = vpack.i.bf16 %v1072_v31, %v1071_v30  ;;  %v4746_v43 = vunpack.c.h.bf16 %v3532_v17  ;;  %v4749_v45 = vunpack.c.l.bf16 %v3542_v19  ;;  %v4748_v46 = vunpack.c.h.bf16 %v3542_v19 }
  0x24   :  { %v3200_v26 = vld [vmem:[%s4724_s6 + $0x18] sm:$0xff]   ;;  %v3202_v37 = vld [vmem:[%s4724_s6 + $0x8] sm:$0xff]   ;;  %3109 = vrot.lane.b32.xlu1 %v3108_v33, %s3423_s22  ;;  %v3123_v44 = vpack.i.bf16 %v4751_v40, %v1075_v39  ;;  %v4745_v52 = vunpack.c.h.bf16 %v3498_v6  ;;  %v3138_v53 = vpack.i.bf16 %v4744_v48, %v4730_v47  ;;  %v4729_v54 = vunpack.c.l.bf16 %v3500_v7 }
  0x25   :  { %2975 = vmatmul.mubr.msk.bf16.vlgmr.msra.gmra.mxu0 %vm194_vm0, %v3490_v3  ;;  %2991 = vmatmul.mubr.msk.bf16.vlgmr.msra.gmra.mxu1 %vm194_vm0, %v3498_v6  ;;  %v3128_v49 = vpack.i.bf16 %v4746_v43, %v4733_v42  ;;  %v3133_v50 = vpack.i.bf16 %v4748_v46, %v4749_v45  ;;  %v4740_v55 = vunpack.c.h.bf16 %v3500_v7  ;;  %v4743_v57 = vunpack.c.l.bf16 %v3506_v10 }
  0x26   :  { %2978 = vmatprep.mubr.msk.bf16.mxu0 %vm194_vm0, %v3492_v4  ;;  %2994 = vmatprep.mubr.msk.bf16.mxu1 %vm194_vm0, %v3500_v7  ;;  %v3143_v56 = vpack.i.bf16 %v4745_v52, %v4747_v51  ;;  %v4742_v58 = vunpack.c.h.bf16 %v3506_v10  ;;  %v4728_v60 = vunpack.c.l.bf16 %v3514_v12  ;;  %v4738_v61 = vunpack.c.h.bf16 %v3514_v12 }
  0x27   :  { %3007 = vmatpush3.bf16.msra.mxu1 %v3196_v8  ;;  %3046 = vmatprep.subr.bf16.mxu0 %v3200_v26  ;;  %v3148_v59 = vpack.i.bf16 %v4740_v55, %v4729_v54  ;;  %v4741_v63 = vunpack.c.l.bf16 %v3530_v16  ;;  %v4739_v0 = vunpack.c.h.bf16 %v3530_v16  ;;  %v4727_v8 = vunpack.c.l.bf16 %v3534_v18 }
  0x28   :  { %3008 = vmatprep.subr.bf16.mxu1 %v3197_v13  ;;  %3047 = vmatpush3.bf16.msra.mxu0 %v3200_v26  ;;  %v3153_v62 = vpack.i.bf16 %v4742_v58, %v4743_v57  ;;  %v3158_v1 = vpack.i.bf16 %v4738_v61, %v4728_v60  ;;  %v4737_v26 = vunpack.c.h.bf16 %v3546_v20  ;;  %vm2749_vm4 = vcmask 1043459  }
  0x29   :  { %3048 = vmatprep.subr.bf16.mxu0 %v3201_v27  ;;  %3104 = vrot.lane.b32.xlu0 %v3103_v34, %s3423_s22  ;;  %vm2751_vm5 = vcmask 1044484   ;;  %vm2753_vm6 = vcmask 1045509   ;;  %vm2755_vm7 = vcmask 1046534   ;;  %vm2757_vm8 = vcmask 1047559  }
  0x2a   :  { %3114 = vrot.lane.b32.xlu1 %v3113_v38, %s3423_s22  ;;  %vm2816_vm9 = vcmask 785408  }
  0x2b   :  { %3009 = vmatpush3.bf16.msra.mxu1 %v3197_v13  ;;  %v4736_v13 = vunpack.c.h.bf16 %v3534_v18 }
  0x2c   :  { %3010 = vmatprep.subr.bf16.mxu1 %v3198_v14  ;;  %3049 = vmatpush3.bf16.msra.mxu0 %v3201_v27 }
  0x2d   :  { %2979 = vmatmul.mubr.msk.bf16.gmra.mxu0 %vm194_vm0, %v3504_v9  ;;  %2995 = vmatmul.mubr.msk.bf16.gmra.mxu1 %vm194_vm0, %v3506_v10  ;;  %v3168_v27 = vpack.i.bf16 %v4736_v13, %v4727_v8  ;;  %v4753_v9 = vunpack.c.h.bf16 %v3510_v11 }
  0x2e   :  { %2982 = vmatprep.mubr.msk.bf16.mxu0 %vm194_vm0, %v3510_v11  ;;  %2998 = vmatprep.mubr.msk.bf16.mxu1 %vm194_vm0, %v3514_v12 }
  0x2f   :  { %3011 = vmatpush3.bf16.msra.mxu1 %v3198_v14  ;;  %3050 = vmatprep.subr.bf16.mxu0 %v3202_v37  ;;  %v3163_v14 = vpack.i.bf16 %v4739_v0, %v4741_v63 }
  0x30   :  { %3012 = vmatprep.subr.bf16.mxu1 %v3199_v21  ;;  %3051 = vmatpush3.bf16.msra.mxu0 %v3202_v37 }
  0x31   :  { %3119 = vrot.lane.b32.xlu0 %v3118_v41, %s3423_s22  ;;  %3124 = vrot.lane.b32.xlu1 %v3123_v44, %s3423_s22  ;;  %v3678_v41 = vld [vmem:[%s4721_s3] ss:$0 sm:$0xff] }
  0x33   :  { %3013 = vmatpush3.bf16.msra.mxu1 %v3199_v21  ;;  %v4734_v21 = vunpack.c.l.bf16 %v3546_v20 }
  0x35   :  { %2983 = vmatmul.mubr.msk.bf16.gmra.mxu0 %vm194_vm0, %v3526_v15  ;;  %2999 = vmatmul.mubr.msk.bf16.gmra.mxu1 %vm194_vm0, %v3530_v16  ;;  %v3173_v32 = vpack.i.bf16 %v4737_v26, %v4734_v21 }
  0x36   :  { %2986 = vmatprep.mubr.msk.bf16.mxu0 %vm194_vm0, %v3532_v17  ;;  %3002 = vmatprep.mubr.msk.bf16.mxu1 %vm194_vm0, %v3534_v18 }
  0x37   :  { %3129 = vrot.lane.b32.xlu0 %v3128_v49, %s3423_s22  ;;  %3134 = vrot.lane.b32.xlu1 %v3133_v50, %s3423_s22 }
  0x3b   :  { %3139 = vrot.lane.b32.xlu0 %v3138_v53, %s3423_s22  ;;  %3144 = vrot.lane.b32.xlu1 %v3143_v56, %s3423_s22 }
  0x3d   :  { %2987 = vmatmul.mubr.msk.bf16.gmra.mxu0 %vm194_vm0, %v3542_v19  ;;  %3003 = vmatmul.mubr.msk.bf16.gmra.mxu1 %vm194_vm0, %v3546_v20 }
  0x3f   :  { %3149 = vrot.lane.b32.xlu0 %v3148_v59, %s3423_s22  ;;  %3154 = vrot.lane.b32.xlu1 %v3153_v62, %s3423_s22 }
  0x43   :  { %3159 = vrot.lane.b32.xlu0 %v3158_v1, %s3423_s22  ;;  %3164 = vrot.lane.b32.xlu1 %v3163_v14, %s3423_s22 }
  0x47   :  { %3169 = vrot.lane.b32.xlu0 %v3168_v27, %s3423_s22  ;;  %3174 = vrot.lane.b32.xlu1 %v3173_v32, %s3423_s22 }
  0xe5   :  { %v2976_v33 = vpop.f32.mrf.mxu0  ;;  %v3673_v34 = vpop.f32.mrf.mxu1 }
  0xe6   :  { %v286_v56 = vadd.f32 %v2976_v33, %v3678_v41 }
  0xe7   :  { %v277_v37 = vpop.f32.mrf.mxu0  ;;  %v341_v38 = vpop.f32.mrf.mxu1 }
  0xe8   :  { %v278_v50 = vadd.f32 %v3678_v41, %v277_v37  ;;  %v406_v54 = vmax.f32 %v286_v56, 0.0 }
  0xe9   :  { %v2977_v44 = vpop.f32.mrf.mxu0  ;;  %v3680_v49 = vpop.f32.mrf.mxu1 }
  0xea   :  { %v289_v53 = vadd.f32 %v2977_v44, %v3678_v41  ;;  %v404_v8 = vmax.f32 %v278_v50, 0.0 }
  0xeb   :  { %v280_v59 = vpop.f32.mrf.mxu0  ;;  %v344_v62 = vpop.f32.mrf.mxu1 }
  0xec   :  { %v281_v1 = vadd.f32 %v3678_v41, %v280_v59  ;;  %v407_v14 = vmax.f32 %v289_v53, 0.0 }
  0xed   :  { %v2980_v27 = vpop.f32.mrf.mxu0  ;;  %v3686_v32 = vpop.f32.mrf.mxu1 }
  0xee   :  { %v405_v60 = vmax.f32 %v281_v1, 0.0  ;;  %v437_v37 = vpack.c.bf16 %v407_v14, %v406_v54  ;;  %v302_v53 = vadd.f32 %v2980_v27, %v3678_v41 }
  0xef   :  { %v293_v47 = vpop.f32.mrf.mxu0  ;;  %v357_v35 = vpop.f32.mrf.mxu1 }
  0xf0   :  { %v436_v22 = vpack.c.bf16 %v405_v60, %v404_v8  ;;  %v294_v33 = vadd.f32 %v3678_v41, %v293_v47  ;;  %v410_v14 = vmax.f32 %v302_v53, 0.0 }
  0xf1   :  { %v2981_v42 = vpop.f32.mrf.mxu0  ;;  %v3688_v44 = vpop.f32.mrf.mxu1 }
  0xf2   :  { %v305_v21 = vadd.f32 %v2981_v42, %v3678_v41  ;;  %3014 = vmatprep.mubr.msk.bf16.mxu1 %vm491_vm1, %v436_v22  ;;  %v408_v54 = vmax.f32 %v294_v33, 0.0 }
  0xf3   :  { %v296_v59 = vpop.f32.mrf.mxu0  ;;  %3015 = vmatmul.mubr.msk.bf16.vlgmr.msra.gmra.mxu1 %vm491_vm1, %v437_v37  ;;  %v360_v60 = vpop.f32.mrf.mxu1 }
  0xf4   :  { %v297_v50 = vadd.f32 %v3678_v41, %v296_v59  ;;  %v411_v56 = vmax.f32 %v305_v21, 0.0 }
  0xf5   :  { %v2984_v1 = vpop.f32.mrf.mxu0  ;;  %v3696_v42 = vpop.f32.mrf.mxu1 }
  0xf6   :  { %v409_v8 = vmax.f32 %v297_v50, 0.0  ;;  %v439_v47 = vpack.c.bf16 %v411_v56, %v410_v14  ;;  %v318_v37 = vadd.f32 %v2984_v1, %v3678_v41 }
  0xf7   :  { %v309_v28 = vpop.f32.mrf.mxu0  ;;  %v373_v50 = vpop.f32.mrf.mxu1 }
  0xf8   :  { %v438_v13 = vpack.c.bf16 %v409_v8, %v408_v54  ;;  %v310_v22 = vadd.f32 %v3678_v41, %v309_v28  ;;  %v414_v8 = vmax.f32 %v318_v37, 0.0  ;;  %v342_v28 = vadd.f32 %v3678_v41, %v341_v38 }
  0xf9   :  { %v2985_v26 = vpop.f32.mrf.mxu0  ;;  %v3001_v1 = vpop.f32.mrf.mxu1 }
  0xfa   :  { %v321_v27 = vadd.f32 %v2985_v26, %v3678_v41  ;;  %3018 = vmatprep.mubr.msk.bf16.mxu1 %vm491_vm1, %v438_v13  ;;  %v412_v56 = vmax.f32 %v310_v22, 0.0  ;;  %v345_v26 = vadd.f32 %v3678_v41, %v344_v62  ;;  %v420_v37 = vmax.f32 %v342_v28, 0.0 }
  0xfb   :  { %v312_v21 = vpop.f32.mrf.mxu0  ;;  %3019 = vmatmul.mubr.msk.bf16.gmra.mxu1 %vm491_vm1, %v439_v47  ;;  %v376_v62 = vpop.f32.mrf.mxu1  ;;  %v353_v28 = vadd.f32 %v3680_v49, %v3678_v41  ;;  %v366_v49 = vadd.f32 %v3686_v32, %v3678_v41  ;;  %v382_v32 = vadd.f32 %v3696_v42, %v3678_v41 }
  0xfc   :  { %v313_v33 = vadd.f32 %v3678_v41, %v312_v21  ;;  %v415_v53 = vmax.f32 %v321_v27, 0.0  ;;  %v421_v38 = vmax.f32 %v345_v26, 0.0 }
  0xfd   :  { %v2988_v59 = vpop.f32.mrf.mxu0 }
  0xfe   :  { %v413_v54 = vmax.f32 %v313_v33, 0.0  ;;  %v441_v13 = vpack.c.bf16 %v415_v53, %v414_v8  ;;  %v334_v27 = vadd.f32 %v2988_v59, %v3678_v41  ;;  %v350_v59 = vadd.f32 %v3673_v34, %v3678_v41 }
  0xff   :  { %v325_v14 = vpop.f32.mrf.mxu0  ;;  %v377_v34 = vadd.f32 %v3678_v41, %v376_v62 }
 0x100   :  { %v440_v61 = vpack.c.bf16 %v413_v54, %v412_v56  ;;  %v326_v55 = vadd.f32 %v3678_v41, %v325_v14  ;;  %v418_v54 = vmax.f32 %v334_v27, 0.0  ;;  %v444_v14 = vpack.c.bf16 %v421_v38, %v420_v37 }
 0x101   :  { %v2989_v0 = vpop.f32.mrf.mxu0 }
 0x102   :  { %v337_v47 = vadd.f32 %v2989_v0, %v3678_v41  ;;  %3022 = vmatprep.mubr.msk.bf16.mxu1 %vm491_vm1, %v440_v61  ;;  %v416_v53 = vmax.f32 %v326_v55, 0.0  ;;  %v358_v0 = vadd.f32 %v3678_v41, %v357_v35  ;;  %v361_v61 = vadd.f32 %v3678_v41, %v360_v60 }
 0x103   :  { %v328_v22 = vpop.f32.mrf.mxu0  ;;  %3023 = vmatmul.mubr.msk.bf16.gmra.mxu1 %vm491_vm1, %v441_v13  ;;  %v3004_v13 = vpop.f32.mrf.mxu1  ;;  %v423_v35 = vmax.f32 %v353_v28, 0.0 }
 0x104   :  { %v329_v21 = vadd.f32 %v3678_v41, %v328_v22  ;;  %v419_v33 = vmax.f32 %v337_v47, 0.0  ;;  %v424_v55 = vmax.f32 %v358_v0, 0.0  ;;  %v425_v26 = vmax.f32 %v361_v61, 0.0 }
 0x105   :  { %v422_v47 = vmax.f32 %v350_v59, 0.0  ;;  %v389_v27 = vpop.f32.mrf.mxu1  ;;  %v374_v22 = vadd.f32 %v3678_v41, %v373_v50  ;;  %v430_v59 = vmax.f32 %v382_v32, 0.0  ;;  %v702_v32 = vld [vmem:[%s4718_s0 + $0x8] sm:$0xff] }
 0x106   :  { %v417_v56 = vmax.f32 %v329_v21, 0.0  ;;  %v443_v63 = vpack.c.bf16 %v419_v33, %v418_v54  ;;  %v446_v60 = vpack.c.bf16 %v425_v26, %v424_v55  ;;  %v369_v21 = vadd.f32 %v3688_v44, %v3678_v41 }
 0x107   :  { %v445_v37 = vpack.c.bf16 %v423_v35, %v422_v47  ;;  %v428_v38 = vmax.f32 %v374_v22, 0.0  ;;  %v429_v33 = vmax.f32 %v377_v34, 0.0  ;;  %v390_v62 = vadd.f32 %v3678_v41, %v389_v27 }
 0x108   :  { %v442_v8 = vpack.c.bf16 %v417_v56, %v416_v53  ;;  %v426_v53 = vmax.f32 %v366_v49, 0.0  ;;  %v427_v56 = vmax.f32 %v369_v21, 0.0  ;;  %v385_v44 = vadd.f32 %v3001_v1, %v3678_v41  ;;  %v701_v21 = vld [vmem:[%s4718_s0] sm:$0xff] }
 0x109   :  { %v448_v50 = vpack.c.bf16 %v429_v33, %v428_v38  ;;  %v432_v0 = vmax.f32 %v390_v62, 0.0  ;;  %v398_v47 = vadd.f32 %v3004_v13, %v3678_v41  ;;  %v3424_v22 = vmov 1966171168  }
 0x10a   :  { %3026 = vmatprep.mubr.msk.bf16.mxu1 %vm491_vm1, %v442_v8  ;;  %v431_v28 = vmax.f32 %v385_v44, 0.0  ;;  %v711_v34 = vunpack.c.l.s4 %v3424_v22  ;;  %v713_v13 = vlaneseq  ;;  %v709_v33 = vcombine.high %v701_v21, %v701_v21 }
 0x10b   :  { %3027 = vmatmul.mubr.msk.bf16.gmra.mxu1 %vm491_vm1, %v443_v63  ;;  %v3005_v63 = vpop.f32.mrf.mxu1  ;;  %v434_v42 = vmax.f32 %v398_v47, 0.0 }
 0x10c   :  { %3030 = vmatprep.mubr.msk.bf16.mxu1 %vm491_vm1, %v444_v14  ;;  %v447_v14 = vpack.c.bf16 %v427_v56, %v426_v53  ;;  %v449_v26 = vpack.c.bf16 %v431_v28, %v430_v59  ;;  %v401_v35 = vadd.f32 %v3005_v63, %v3678_v41  ;;  %v3100_v56 = vpop.permute.xlu0 %3099 }
 0x10d   :  { %v392_v54 = vpop.f32.mrf.mxu1 }
 0x10e   :  { %v393_v8 = vadd.f32 %v3678_v41, %v392_v54  ;;  %v435_v1 = vmax.f32 %v401_v35, 0.0  ;;  %v714_v41 = vshrl.u32 %v713_v13, 7  ;;  %v3770_v35 = vld [vmem:[%s4723_s5] ss:$0 sm:$0xff]  ;;  %s3425_s5 = smov 32  }
 0x110   :  { %v433_v61 = vmax.f32 %v393_v8, 0.0  ;;  %v451_v27 = vpack.c.bf16 %v435_v1, %v434_v42  ;;  %v3753_v8 = vsub.s32 0, %v714_v41  ;;  %v3101_v42 = vunpack.i.l.bf16 %v3100_v56 }
 0x112   :  { %v450_v55 = vpack.c.bf16 %v433_v61, %v432_v0  ;;  %v3758_v0 = vpop.permute.xlu1 %3109  ;;  %v3105_v61 = vpop.permute.xlu0 %3104 }
 0x113   :  { %3031 = vmatmul.mubr.msk.bf16.gmra.mxu1 %vm491_vm1, %v445_v37  ;;  %v712_v37 = vunpack.c.0.s8 %v711_v34 }
 0x114   :  { %3034 = vmatprep.mubr.msk.bf16.mxu1 %vm491_vm1, %v446_v60  ;;  %v3204_v60 = vld [vmem:[%s4724_s6] sm:$0xff]  }
 0x115   :  { %3052 = vmatprep.subr.bf16.mxu0 %v3204_v60  ;;  %v3744_v49 = vsub.s32 %v712_v37, %v714_v41 }
 0x116   :  { %3053 = vmatpush3.bf16.msra.mxu0 %v3204_v60  ;;  %v3106_v60 = vunpack.i.l.bf16 %v3105_v61 }
 0x117   :  { %v716_v63 = vrot.slane %v701_v21, %v3744_v49  ;;  %v3115_v21 = vpop.permute.xlu1 %3114 }
 0x118   :  { %v3116_v57 = vunpack.i.l.bf16 %v3115_v21 }
 0x119   :  { %v724_v38 = vcombine.high %v716_v63, %v716_v63  ;;  %v732_v53 = vrot.slane %v716_v63, %v3744_v49 }
 0x11b   :  { %3035 = vmatmul.mubr.msk.bf16.gmra.mxu1 %vm491_vm1, %v447_v14  ;;  %v746_v54 = vrot.slane %v724_v38, %v3744_v49  ;;  %v754_v14 = vcombine.high %v732_v53, %v732_v53 }
 0x11c   :  { %3038 = vmatprep.mubr.msk.bf16.mxu1 %vm491_vm1, %v448_v50  ;;  %v723_v50 = vrot.slane %v709_v33, %v3744_v49  ;;  %v3102_v33 = vunpack.i.h.bf16 %v3100_v56 }
 0x11d   :  { %v756_v44 = vcombine.high %v746_v54, %v746_v54  ;;  %v916_v47 = vrot.slane %v754_v14, %v3753_v8  ;;  %v912_v38 = vrot.slane %v746_v54, %v3753_v8  ;;  %v758_v54 = vcombine.high %v702_v32, %v702_v32 }
 0x11e   :  { %v725_v62 = vcombine.high %v723_v50, %v723_v50  ;;  %v739_v59 = vrot.slane %v723_v50, %v3744_v49  ;;  %v3111_v50 = vunpack.i.l.bf16 %v3758_v0 }
 0x11f   :  { %v920_v1 = vrot.slane %v756_v44, %v3753_v8 }
 0x120   :  { %v3762_v28 = vrot.slane %v725_v62, %v3744_v49  ;;  %v755_v34 = vcombine.high %v739_v59, %v739_v59 }
 0x122   :  { %v757_v41 = vcombine.high %v3762_v28, %v3762_v28 }
 0x123   :  { %3039 = vmatmul.mubr.msk.bf16.gmra.mxu1 %vm491_vm1, %v449_v26  ;;  %v908_v26 = vrot.slane %v732_v53, %v3753_v8  ;;  %v924_v53 = vrot.slane %v739_v59, %v3753_v8 }
 0x124   :  { %3042 = vmatprep.mubr.msk.bf16.mxu1 %vm491_vm1, %v450_v55  ;;  %v765_v55 = vrot.slane %v702_v32, %v3744_v49 }
 0x125   :  { %v1225_v14 = vsub.f32 %v908_v26, %v3101_v42  ;;  %v936_v26 = vrot.slane %v757_v41, %v3753_v8  ;;  %v3117_v42 = vunpack.i.h.bf16 %v3115_v21 }
 0x126   :  { %v773_v13 = vcombine.high %v765_v55, %v765_v55  ;;  %v3777_v63 = vrot.slane %v765_v55, %v3744_v49  ;;  %v932_v55 = vrot.slane %v755_v34, %v3753_v8  ;;  %v928_v34 = vrot.slane %v3762_v28, %v3753_v8 }
 0x128   :  { %v3788_v56 = vrot.slane %v773_v13, %v3744_v49  ;;  %v1231_v21 = vsub.f32 %v932_v55, %v3116_v57  ;;  %v940_v57 = vrot.slane %v3777_v63, %v3753_v8 }
 0x12b   :  { %3043 = vmatmul.mubr.msk.bf16.gmra.mxu1 %vm491_vm1, %v451_v27  ;;  %v3107_v27 = vunpack.i.h.bf16 %v3105_v61  ;;  %v1227_v61 = vsub.f32 %v916_v47, %v3106_v60  ;;  %v803_v47 = vcombine.high %v3777_v63, %v3777_v63  ;;  %v1229_v60 = vsub.f32 %v924_v53, %v3111_v50 }
 0x12c   :  { %v1232_v53 = vsub.f32 %v936_v26, %v3117_v42 }
 0x12d   :  { %v1228_v44 = vsub.f32 %v920_v1, %v3107_v27  ;;  %v1226_v1 = vsub.f32 %v912_v38, %v3102_v33  ;;  %v3112_v27 = vunpack.i.h.bf16 %v3758_v0  ;;  %v805_v38 = vcombine.high %v3788_v56, %v3788_v56  ;;  %v3120_v0 = vpop.permute.xlu0 %3119 }
 0x12e   :  { %v772_v33 = vrot.slane %v758_v54, %v3744_v49  ;;  %v3121_v54 = vunpack.i.l.bf16 %v3120_v0 }
 0x12f   :  { %v952_v42 = vrot.slane %v805_v38, %v3753_v8 }
 0x1b3   :  { %v3016_v22 = vpop.f32.mrf.mxu1 }
 0x1b4   :  { %v583_v37 = vadd.f32 %v3016_v22, %v3770_v35 }
 0x1b5   :  { %v574_v62 = vpop.f32.mrf.mxu1 }
 0x1b6   :  { %v3783_v22 = vadd.f32 %v3770_v35, %v574_v62  ;;  %1621 = vrot.lane.b32.xlu0 %v583_v37, %s3425_s5  ;;  %v1259_v41 = vadd.f32 %v1227_v61, %v583_v37  ;;  %v774_v37 = vcombine.high %v772_v33, %v772_v33 }
 0x1b7   :  { %v3017_v58 = vpop.f32.mrf.mxu1 }
 0x1b8   :  { %v586_v59 = vadd.f32 %v3017_v58, %v3770_v35  ;;  %v1257_v13 = vadd.f32 %v1225_v14, %v3783_v22  ;;  %v3125_v58 = vpop.permute.xlu1 %3124  ;;  %v948_v14 = vrot.slane %v803_v47, %v3753_v8  ;;  %v3823_v38 = vrot.slane %v774_v37, %v3744_v49 }
 0x1b9   :  { %v577_v62 = vpop.f32.mrf.mxu1  ;;  %v3127_v47 = vunpack.i.h.bf16 %v3125_v58  ;;  %v1233_v37 = vsub.f32 %v940_v57, %v3121_v54 }
 0x1ba   :  { %v1260_v48 = vadd.f32 %v1228_v44, %v586_v59  ;;  %v578_v32 = vadd.f32 %v3770_v35, %v577_v62  ;;  %1623 = vrot.lane.b32.xlu1 %v586_v59, %s3425_s5  ;;  %v3126_v62 = vunpack.i.l.bf16 %v3125_v58  ;;  %v1289_v61 = vmax.f32 %v1257_v13, 0.0 }
 0x1bb   :  { %v3020_v52 = vpop.f32.mrf.mxu1  ;;  %v944_v13 = vrot.slane %v3788_v56, %v3753_v8 }
 0x1bc   :  { %v1258_v50 = vadd.f32 %v1226_v1, %v578_v32  ;;  %v599_v28 = vadd.f32 %v3020_v52, %v3770_v35  ;;  %1619 = vrot.lane.b32.xlu0 %v578_v32, %s3425_s5  ;;  %v1292_v44 = vmax.f32 %v1260_v48, 0.0  ;;  %v1291_v52 = vmax.f32 %v1259_v41, 0.0  ;;  %v3135_v56 = vpop.permute.xlu1 %3134 }
 0x1bd   :  { %v590_v59 = vpop.f32.mrf.mxu1  ;;  %v3814_v48 = vrot.slane %v772_v33, %v3744_v49  ;;  %v3122_v32 = vunpack.i.h.bf16 %v3120_v0 }
 0x1be   :  { %v1290_v55 = vmax.f32 %v1258_v50, 0.0  ;;  %v3809_v43 = vadd.f32 %v3770_v35, %v590_v59  ;;  %1629 = vrot.lane.b32.xlu1 %v599_v28, %s3425_s5  ;;  %v703_v50 = vld [vmem:[%s4718_s0 + $0x10] sm:$0xff]  ;;  %v1230_v59 = vsub.f32 %v928_v34, %v3112_v27  ;;  %v1322_v41 = vpack.c.bf16 %v1292_v44, %v1291_v52 }
 0x1bf   :  { %v3021_v26 = vpop.f32.mrf.mxu1  ;;  %v1263_v0 = vadd.f32 %v1231_v21, %v599_v28  ;;  %v804_v27 = vcombine.high %v3814_v48, %v3814_v48  ;;  %v814_v34 = vrot.slane %v703_v50, %v3744_v49  ;;  %v1236_v44 = vsub.f32 %v952_v42, %v3127_v47 }
 0x1c0   :  { %v1321_v1 = vpack.c.bf16 %v1290_v55, %v1289_v61  ;;  %v602_v63 = vadd.f32 %v3021_v26, %v3770_v35  ;;  %v1261_v58 = vadd.f32 %v1229_v60, %v3809_v43  ;;  %v1235_v55 = vsub.f32 %v948_v14, %v3126_v62  ;;  %v3130_v14 = vpop.permute.xlu0 %3129 }
 0x1c1   :  { %v593_v51 = vpop.f32.mrf.mxu1  ;;  %v806_v21 = vcombine.high %v3823_v38, %v3823_v38  ;;  %v3136_v28 = vunpack.i.l.bf16 %v3135_v56  ;;  %v822_v62 = vcombine.high %v814_v34, %v814_v34  ;;  %v1295_v42 = vmax.f32 %v1263_v0, 0.0 }
 0x1c2   :  { %v1264_v33 = vadd.f32 %v1232_v53, %v602_v63  ;;  %v594_v61 = vadd.f32 %v3770_v35, %v593_v51  ;;  %1631 = vrot.lane.b32.xlu0 %v602_v63, %s3425_s5  ;;  %3054 = vmatprep.mubr.msk.bf16.mxu0 %vm491_vm1, %v1321_v1  ;;  %v1234_v53 = vsub.f32 %v944_v13, %v3122_v32  ;;  %v1293_v1 = vmax.f32 %v1261_v58, 0.0 }
 0x1c3   :  { %v3024_v26 = vpop.f32.mrf.mxu1  ;;  %3055 = vmatmul.mubr.msk.bf16.vlgmr.msra.gmra.mxu0 %vm491_vm1, %v1322_v41  ;;  %v964_v57 = vrot.slane %v804_v27, %v3753_v8  ;;  %v3842_v54 = vrot.slane %v814_v34, %v3744_v49  ;;  %v807_v13 = vcombine.high %v703_v50, %v703_v50  ;;  %v956_v58 = vrot.slane %v3814_v48, %v3753_v8 }
 0x1c4   :  { %v1262_v60 = vadd.f32 %v1230_v59, %v594_v61  ;;  %1627 = vrot.lane.b32.xlu1 %v594_v61, %s3425_s5  ;;  %v1296_v51 = vmax.f32 %v1264_v33, 0.0  ;;  %v615_v41 = vadd.f32 %v3024_v26, %v3770_v35  ;;  %v3131_v33 = vunpack.i.l.bf16 %v3130_v14 }
 0x1c5   :  { %v606_v52 = vpop.f32.mrf.mxu1  ;;  %v968_v26 = vrot.slane %v806_v21, %v3753_v8  ;;  %v3137_v0 = vunpack.i.h.bf16 %v3135_v56  ;;  %v3850_v27 = vrot.slane %v822_v62, %v3744_v49  ;;  %v852_v56 = vcombine.high %v3842_v54, %v3842_v54 }
 0x1c6   :  { %v1294_v63 = vmax.f32 %v1262_v60, 0.0  ;;  %v3838_v46 = vadd.f32 %v3770_v35, %v606_v52  ;;  %v1324_v61 = vpack.c.bf16 %v1296_v51, %v1295_v42  ;;  %v1267_v48 = vadd.f32 %v1235_v55, %v615_v41  ;;  %v3145_v42 = vpop.permute.xlu1 %3144 }
 0x1c7   :  { %v3025_v47 = vpop.f32.mrf.mxu1  ;;  %v821_v21 = vrot.slane %v807_v13, %v3744_v49  ;;  %v1239_v62 = vsub.f32 %v964_v57, %v3136_v28 }
 0x1c8   :  { %v1323_v32 = vpack.c.bf16 %v1294_v63, %v1293_v1  ;;  %v618_v59 = vadd.f32 %v3025_v47, %v3770_v35  ;;  %1637 = vrot.lane.b32.xlu1 %v615_v41, %s3425_s5  ;;  %v1265_v34 = vadd.f32 %v1233_v37, %v3838_v46  ;;  %v960_v1 = vrot.slane %v3823_v38, %v3753_v8  ;;  %v3140_v41 = vpop.permute.xlu0 %3139 }
 0x1c9   :  { %v609_v60 = vpop.f32.mrf.mxu1  ;;  %v3132_v63 = vunpack.i.h.bf16 %v3130_v14  ;;  %v1240_v38 = vsub.f32 %v968_v26, %v3137_v0  ;;  %v854_v14 = vcombine.high %v3850_v27, %v3850_v27  ;;  %v1299_v28 = vmax.f32 %v1267_v48, 0.0 }
 0x1ca   :  { %v1268_v50 = vadd.f32 %v1236_v44, %v618_v59  ;;  %v610_v52 = vadd.f32 %v3770_v35, %v609_v60  ;;  %3058 = vmatprep.mubr.msk.bf16.mxu0 %vm491_vm1, %v1323_v32  ;;  %v1237_v44 = vsub.f32 %v956_v58, %v3131_v33  ;;  %v823_v32 = vcombine.high %v821_v21, %v821_v21 }
 0x1cb   :  { %v3028_v51 = vpop.f32.mrf.mxu1  ;;  %3059 = vmatmul.mubr.msk.bf16.gmra.mxu0 %vm491_vm1, %v1324_v61  ;;  %v1297_v61 = vmax.f32 %v1265_v34, 0.0  ;;  %v1238_v57 = vsub.f32 %v960_v1, %v3132_v63  ;;  %v980_v58 = vrot.slane %v852_v56, %v3753_v8  ;;  %v3146_v33 = vunpack.i.l.bf16 %v3145_v42 }
 0x1cc   :  { %v1266_v37 = vadd.f32 %v1234_v53, %v610_v52  ;;  %1639 = vrot.lane.b32.xlu1 %v618_v59, %s3425_s5  ;;  %1635 = vrot.lane.b32.xlu0 %v610_v52, %s3425_s5  ;;  %v1300_v47 = vmax.f32 %v1268_v50, 0.0  ;;  %v631_v13 = vadd.f32 %v3028_v51, %v3770_v35  ;;  %v972_v34 = vrot.slane %v3842_v54, %v3753_v8  ;;  %v704_v52 = vld [vmem:[%s4718_s0 + $0x18] sm:$0xff] }
 0x1cd   :  { %v622_v55 = vpop.f32.mrf.mxu1  ;;  %v3141_v50 = vunpack.i.l.bf16 %v3140_v41  ;;  %v984_v1 = vrot.slane %v854_v14, %v3753_v8  ;;  %v3147_v48 = vunpack.i.h.bf16 %v3145_v42  ;;  %v3879_v56 = vrot.slane %v823_v32, %v3744_v49 }
 0x1ce   :  { %v1298_v60 = vmax.f32 %v1266_v37, 0.0  ;;  %v3867_v53 = vadd.f32 %v3770_v35, %v622_v55  ;;  %v1326_v51 = vpack.c.bf16 %v1300_v47, %v1299_v28  ;;  %v837_v54 = vrot.slane %v821_v21, %v3744_v49 }
 0x1cf   :  { %v3029_v59 = vpop.f32.mrf.mxu1  ;;  %v976_v47 = vrot.slane %v3850_v27, %v3753_v8  ;;  %v3142_v28 = vunpack.i.h.bf16 %v3140_v41  ;;  %v863_v42 = vrot.slane %v704_v52, %v3744_v49  ;;  %v1243_v32 = vsub.f32 %v980_v58, %v3146_v33 }
 0x1d0   :  { %v1325_v26 = vpack.c.bf16 %v1298_v60, %v1297_v61  ;;  %v634_v0 = vadd.f32 %v3029_v59, %v3770_v35  ;;  %1645 = vrot.lane.b32.xlu0 %v631_v13, %s3425_s5  ;;  %v1269_v37 = vadd.f32 %v1237_v44, %v3867_v53  ;;  %v1271_v60 = vadd.f32 %v1239_v62, %v631_v13  ;;  %v3155_v62 = vpop.permute.xlu1 %3154 }
 0x1d1   :  { %v625_v63 = vpop.f32.mrf.mxu1  ;;  %v855_v21 = vcombine.high %v3879_v56, %v3879_v56  ;;  %v871_v27 = vcombine.high %v863_v42, %v863_v42  ;;  %v1244_v13 = vsub.f32 %v984_v1, %v3147_v48  ;;  %v1242_v33 = vsub.f32 %v976_v47, %v3142_v28 }
 0x1d2   :  { %v1272_v55 = vadd.f32 %v1240_v38, %v634_v0  ;;  %v626_v61 = vadd.f32 %v3770_v35, %v625_v63  ;;  %3062 = vmatprep.mubr.msk.bf16.mxu0 %vm491_vm1, %v1325_v26  ;;  %v1241_v26 = vsub.f32 %v972_v34, %v3141_v50  ;;  %v1301_v41 = vmax.f32 %v1269_v37, 0.0 }
 0x1d3   :  { %v3032_v14 = vpop.f32.mrf.mxu1  ;;  %3063 = vmatmul.mubr.msk.bf16.gmra.mxu0 %vm491_vm1, %v1326_v51  ;;  %v1303_v58 = vmax.f32 %v1271_v60, 0.0  ;;  %v856_v34 = vcombine.high %v704_v52, %v704_v52  ;;  %v3156_v36 = vunpack.i.l.bf16 %v3155_v62  ;;  %v988_v1 = vrot.slane %v837_v54, %v3753_v8 }
 0x1d4   :  { %v1270_v59 = vadd.f32 %v1238_v57, %v626_v61  ;;  %v647_v44 = vadd.f32 %v3032_v14, %v3770_v35  ;;  %1647 = vrot.lane.b32.xlu0 %v634_v0, %s3425_s5  ;;  %v1304_v38 = vmax.f32 %v1272_v55, 0.0  ;;  %v3150_v57 = vpop.permute.xlu0 %3149  ;;  %v853_v55 = vcombine.high %v837_v54, %v837_v54 }
 0x1d5   :  { %v638_v63 = vpop.f32.mrf.mxu1  ;;  %v1000_v37 = vrot.slane %v855_v21, %v3753_v8  ;;  %v3902_v40 = vrot.slane %v871_v27, %v3744_v49  ;;  %v3157_v52 = vunpack.i.h.bf16 %v3155_v62  ;;  %v870_v21 = vrot.slane %v856_v34, %v3744_v49 }
 0x1d6   :  { %v1302_v45 = vmax.f32 %v1270_v59, 0.0  ;;  %v3894_v51 = vadd.f32 %v3770_v35, %v638_v63  ;;  %1653 = vrot.lane.b32.xlu1 %v647_v44, %s3425_s5  ;;  %v1328_v48 = vpack.c.bf16 %v1304_v38, %v1303_v58  ;;  %v3151_v63 = vunpack.i.l.bf16 %v3150_v57 }
 0x1d7   :  { %v3033_v0 = vpop.f32.mrf.mxu1  ;;  %v996_v54 = vrot.slane %v853_v55, %v3753_v8  ;;  %v879_v38 = vrot.slane %v863_v42, %v3744_v49  ;;  %v3152_v62 = vunpack.i.h.bf16 %v3150_v57 }
 0x1d8   :  { %v1327_v50 = vpack.c.bf16 %v1302_v45, %v1301_v41  ;;  %v650_v14 = vadd.f32 %v3033_v0, %v3770_v35  ;;  %1643 = vrot.lane.b32.xlu0 %v626_v61, %s3425_s5  ;;  %v1273_v60 = vadd.f32 %v1241_v26, %v3894_v51  ;;  %v1275_v61 = vadd.f32 %v1243_v32, %v647_v44 }
 0x1d9   :  { %v641_v59 = vpop.f32.mrf.mxu1  ;;  %v992_v26 = vrot.slane %v3879_v56, %v3753_v8  ;;  %v1245_v58 = vsub.f32 %v988_v1, %v3151_v63  ;;  %v903_v32 = vcombine.high %v3902_v40, %v3902_v40  ;;  %v872_v44 = vcombine.high %v870_v21, %v870_v21  ;;  %v3160_v56 = vpop.permute.xlu0 %3159 }
 0x1da   :  { %v1276_v47 = vadd.f32 %v1244_v13, %v650_v14  ;;  %v642_v45 = vadd.f32 %v3770_v35, %v641_v59  ;;  %1655 = vrot.lane.b32.xlu1 %v650_v14, %s3425_s5  ;;  %3066 = vmatprep.mubr.msk.bf16.mxu0 %vm491_vm1, %v1327_v50  ;;  %v1305_v55 = vmax.f32 %v1273_v60, 0.0  ;;  %v1248_v50 = vsub.f32 %v1000_v37, %v3157_v52 }
 0x1db   :  { %v3036_v28 = vpop.f32.mrf.mxu1  ;;  %3067 = vmatmul.mubr.msk.bf16.gmra.mxu0 %vm491_vm1, %v1328_v48  ;;  %v1307_v57 = vmax.f32 %v1275_v61, 0.0  ;;  %v901_v1 = vcombine.high %v879_v38, %v879_v38  ;;  %v1246_v59 = vsub.f32 %v992_v26, %v3152_v62  ;;  %v1004_v37 = vrot.slane %v879_v38, %v3753_v8 }
 0x1dc   :  { %v1274_v27 = vadd.f32 %v1242_v33, %v642_v45  ;;  %v663_v41 = vadd.f32 %v3036_v28, %v3770_v35  ;;  %v1308_v13 = vmax.f32 %v1276_v47, 0.0  ;;  %v1247_v33 = vsub.f32 %v996_v54, %v3156_v36  ;;  %v3165_v47 = vpop.permute.xlu1 %3164 }
 0x1dd   :  { %v654_v0 = vpop.f32.mrf.mxu1  ;;  %v1016_v52 = vrot.slane %v903_v32, %v3753_v8  ;;  %v3167_v54 = vunpack.i.h.bf16 %v3165_v47  ;;  %v1012_v38 = vrot.slane %v901_v1, %v3753_v8  ;;  %v3166_v62 = vunpack.i.l.bf16 %v3165_v47 }
 0x1de   :  { %v1306_v14 = vmax.f32 %v1274_v27, 0.0  ;;  %v3918_v42 = vadd.f32 %v3770_v35, %v654_v0  ;;  %1651 = vrot.lane.b32.xlu1 %v642_v45, %s3425_s5  ;;  %1661 = vrot.lane.b32.xlu0 %v663_v41, %s3425_s5  ;;  %v1330_v60 = vpack.c.bf16 %v1308_v13, %v1307_v57  ;;  %v3161_v27 = vunpack.i.l.bf16 %v3160_v56 }
 0x1df   :  { %v3037_v34 = vpop.f32.mrf.mxu1  ;;  %v3926_v45 = vrot.slane %v872_v44, %v3744_v49  ;;  %v1279_v26 = vadd.f32 %v1247_v33, %v663_v41  ;;  %v886_v32 = vrot.slane %v870_v21, %v3744_v49  ;;  %v1252_v1 = vsub.f32 %v1016_v52, %v3167_v54 }
 0x1e0   :  { %v1329_v48 = vpack.c.bf16 %v1306_v14, %v1305_v55  ;;  %v666_v63 = vadd.f32 %v3037_v34, %v3770_v35  ;;  %v1277_v61 = vadd.f32 %v1245_v58, %v3918_v42  ;;  %v1008_v58 = vrot.slane %v3902_v40, %v3753_v8  ;;  %v3170_v40 = vpop.permute.xlu0 %3169 }
 0x1e1   :  { %v657_v28 = vpop.f32.mrf.mxu1  ;;  %v3162_v55 = vunpack.i.h.bf16 %v3160_v56  ;;  %v1249_v57 = vsub.f32 %v1004_v37, %v3161_v27  ;;  %v904_v41 = vcombine.high %v3926_v45, %v3926_v45  ;;  %v1311_v49 = vmax.f32 %v1279_v26, 0.0 }
 0x1e2   :  { %v1280_v36 = vadd.f32 %v1248_v50, %v666_v63  ;;  %v658_v0 = vadd.f32 %v3770_v35, %v657_v28  ;;  %1663 = vrot.lane.b32.xlu0 %v666_v63, %s3425_s5  ;;  %3070 = vmatprep.mubr.msk.bf16.mxu0 %vm491_vm1, %v1329_v48  ;;  %v1309_v33 = vmax.f32 %v1277_v61, 0.0  ;;  %v1251_v21 = vsub.f32 %v1012_v38, %v3166_v62  ;;  %v3175_v28 = vpop.permute.xlu1 %3174 }
 0x1e3   :  { %v3040_v13 = vpop.f32.mrf.mxu1  ;;  %3071 = vmatmul.mubr.msk.bf16.gmra.mxu0 %vm491_vm1, %v1330_v60  ;;  %v1250_v37 = vsub.f32 %v1008_v58, %v3162_v55  ;;  %v1032_v52 = vrot.slane %v904_v41, %v3753_v8  ;;  %v3171_v54 = vunpack.i.l.bf16 %v3170_v40  ;;  %v3176_v58 = vunpack.i.l.bf16 %v3175_v28 }
 0x1e4   :  { %v1278_v44 = vadd.f32 %v1246_v59, %v658_v0  ;;  %v679_v50 = vadd.f32 %v3040_v13, %v3770_v35  ;;  %v1312_v14 = vmax.f32 %v1280_v36, 0.0  ;;  %v902_v59 = vcombine.high %v886_v32, %v886_v32 }
 0x1e5   :  { %v670_v34 = vpop.f32.mrf.mxu1  ;;  %v1020_v36 = vrot.slane %v886_v32, %v3753_v8  ;;  %v1024_v32 = vrot.slane %v3926_v45, %v3753_v8 }
 0x1e6   :  { %v1310_v48 = vmax.f32 %v1278_v44, 0.0  ;;  %v3941_v63 = vadd.f32 %v3770_v35, %v670_v34  ;;  %1669 = vrot.lane.b32.xlu1 %v679_v50, %s3425_s5  ;;  %1659 = vrot.lane.b32.xlu0 %v658_v0, %s3425_s5  ;;  %v1332_v27 = vpack.c.bf16 %v1312_v14, %v1311_v49  ;;  %v3177_v44 = vunpack.i.h.bf16 %v3175_v28 }
 0x1e7   :  { %v3041_v56 = vpop.f32.mrf.mxu1  ;;  %v1283_v38 = vadd.f32 %v1251_v21, %v679_v50  ;;  %v1028_v62 = vrot.slane %v902_v59, %v3753_v8 }
 0x1e8   :  { %v1331_v47 = vpack.c.bf16 %v1310_v48, %v1309_v33  ;;  %v682_v60 = vadd.f32 %v3041_v56, %v3770_v35  ;;  %v1281_v13 = vadd.f32 %v1249_v57, %v3941_v63  ;;  %v3172_v57 = vunpack.i.h.bf16 %v3170_v40 }
 0x1e9   :  { %v673_v61 = vpop.f32.mrf.mxu1  ;;  %v1253_v33 = vsub.f32 %v1020_v36, %v3171_v54  ;;  %v1256_v49 = vsub.f32 %v1032_v52, %v3177_v44  ;;  %v1315_v21 = vmax.f32 %v1283_v38, 0.0  ;;  %v1255_v59 = vsub.f32 %v1028_v62, %v3176_v58 }
 0x1ea   :  { %v1284_v0 = vadd.f32 %v1252_v1, %v682_v60  ;;  %v674_v26 = vadd.f32 %v3770_v35, %v673_v61  ;;  %1671 = vrot.lane.b32.xlu1 %v682_v60, %s3425_s5  ;;  %3074 = vmatprep.mubr.msk.bf16.mxu0 %vm491_vm1, %v1331_v47  ;;  %v1313_v48 = vmax.f32 %v1281_v13, 0.0  ;;  %v1254_v8 = vsub.f32 %v1024_v32, %v3172_v57 }
 0x1eb   :  { %v3044_v55 = vpop.f32.mrf.mxu1  ;;  %3075 = vmatmul.mubr.msk.bf16.gmra.mxu0 %vm491_vm1, %v1332_v27  ;;  %v4754_v57 = vunpack.c.l.bf16 %v3542_v19 }
 0x1ec   :  { %v1282_v14 = vadd.f32 %v1250_v37, %v674_v26  ;;  %v695_v34 = vadd.f32 %v3044_v55, %v3770_v35  ;;  %v1316_v41 = vmax.f32 %v1284_v0, 0.0 }
 0x1ed   :  { %v686_v1 = vpop.f32.mrf.mxu1 }
 0x1ee   :  { %v1314_v56 = vmax.f32 %v1282_v14, 0.0  ;;  %v687_v50 = vadd.f32 %v3770_v35, %v686_v1  ;;  %1667 = vrot.lane.b32.xlu1 %v674_v26, %s3425_s5  ;;  %1677 = vrot.lane.b32.xlu0 %v695_v34, %s3425_s5  ;;  %v1334_v40 = vpack.c.bf16 %v1316_v41, %v1315_v21  ;;  %v1287_v61 = vadd.f32 %v1255_v59, %v695_v34 }
 0x1ef   :  { %v3045_v47 = vpop.f32.mrf.mxu1  ;;  %v4752_v14 = vunpack.c.h.bf16 %v3526_v15  ;;  %v4755_v41 = vunpack.c.h.bf16 %v3542_v19  ;;  %v4756_v15 = vunpack.c.l.bf16 %v3498_v6  ;;  %v4758_v59 = vunpack.c.h.bf16 %v3498_v6 }
 0x1f0   :  { %v1333_v37 = vpack.c.bf16 %v1314_v56, %v1313_v48  ;;  %v698_v45 = vadd.f32 %v3045_v47, %v3770_v35  ;;  %v1285_v28 = vadd.f32 %v1253_v33, %v687_v50  ;;  %v1319_v44 = vmax.f32 %v1287_v61, 0.0 }
 0x1f1   :  { %v689_v60 = vpop.f32.mrf.mxu1  ;;  %v4757_v56 = vunpack.c.h.bf16 %v3532_v17  ;;  %v4761_v6 = vunpack.c.h.bf16 %v3506_v10  ;;  %v4762_v61 = vunpack.c.l.bf16 %v3530_v16 }
 0x1f2   :  { %v1288_v27 = vadd.f32 %v1256_v49, %v698_v45  ;;  %v690_v52 = vadd.f32 %v3770_v35, %v689_v60  ;;  %1679 = vrot.lane.b32.xlu1 %v698_v45, %s3425_s5  ;;  %3078 = vmatprep.mubr.msk.bf16.mxu0 %vm491_vm1, %v1333_v37  ;;  %v1317_v13 = vmax.f32 %v1285_v28, 0.0  ;;  %v4760_v60 = vunpack.c.l.bf16 %v3506_v10 }
 0x1f3   :  { %3079 = vmatmul.mubr.msk.bf16.gmra.mxu0 %vm491_vm1, %v1334_v40 }
 0x1f4   :  { %v1286_v36 = vadd.f32 %v1254_v8, %v690_v52  ;;  %1675 = vrot.lane.b32.xlu0 %v690_v52, %s3425_s5  ;;  %v1320_v54 = vmax.f32 %v1288_v27, 0.0  ;;  %v4759_v8 = vunpack.c.h.bf16 %v3494_v5 }
 0x1f6   :  { %v1318_v0 = vmax.f32 %v1286_v36, 0.0  ;;  %1625 = vrot.lane.b32.xlu1 %v3809_v43, %s3425_s5  ;;  %v1336_v35 = vpack.c.bf16 %v1320_v54, %v1319_v44 }
 0x1f8   :  { %v1335_v26 = vpack.c.bf16 %v1318_v0, %v1317_v13  ;;  %1617 = vrot.lane.b32.xlu0 %v3783_v22, %s3425_s5  ;;  %v4763_v0 = vunpack.c.h.bf16 %v3500_v7 }
 0x1fa   :  { %1641 = vrot.lane.b32.xlu1 %v3867_v53, %s3425_s5  ;;  %3082 = vmatprep.mubr.msk.bf16.mxu0 %vm491_vm1, %v1335_v26  ;;  %v4764_v26 = vunpack.c.h.bf16 %v3530_v16 }
 0x1fb   :  { %3083 = vmatmul.mubr.msk.bf16.gmra.mxu0 %vm491_vm1, %v1336_v35 }
 0x1fc   :  { %1633 = vrot.lane.b32.xlu0 %v3838_v46, %s3425_s5 }
 0x1fe   :  { %1665 = vrot.lane.b32.xlu1 %v3941_v63, %s3425_s5 }
 0x200   :  { %1649 = vrot.lane.b32.xlu0 %v3894_v51, %s3425_s5 }
 0x202   :  { %1673 = vrot.lane.b32.xlu1 %v687_v50, %s3425_s5 }
 0x204   :  { %1657 = vrot.lane.b32.xlu0 %v3918_v42, %s3425_s5 }
 0x228   :  { %v1622_v43 = vpop.permute.xlu0 %1621 }
 0x229   :  { %v1715_v22 = vadd.f32 %v1622_v43, %v1067_v24  ;;  %v4765_v43 = vunpack.c.h.bf16 %v3514_v12 }
 0x22b   :  { %2101 = vrot.lane.b32.xlu1 %v1715_v22, %s3425_s5 }
 0x22c   :  { %v1624_v53 = vpop.permute.xlu1 %1623 }
 0x22d   :  { %v1716_v46 = vadd.f32 %v1624_v53, %v1068_v25 }
 0x22e   :  { %v1620_v38 = vpop.permute.xlu0 %1619 }
 0x22f   :  { %v1714_v63 = vadd.f32 %v1620_v38, %v1066_v23  ;;  %2103 = vrot.lane.b32.xlu1 %v1716_v46, %s3425_s5  ;;  %v4766_v38 = vunpack.c.h.bf16 %v3546_v20 }
 0x230   :  { %v1630_v51 = vpop.permute.xlu1 %1629 }
 0x231   :  { %2099 = vrot.lane.b32.xlu0 %v1714_v63, %s3425_s5  ;;  %v1719_v42 = vadd.f32 %v1630_v51, %v1071_v30 }
 0x234   :  { %v1632_v62 = vpop.permute.xlu0 %1631 }
 0x235   :  { %2109 = vrot.lane.b32.xlu0 %v1719_v42, %s3425_s5  ;;  %v1720_v3 = vadd.f32 %v1632_v62, %v1072_v31  ;;  %v4767_v42 = vunpack.c.h.bf16 %v3534_v18 }
 0x236   :  { %v1628_v24 = vpop.permute.xlu1 %1627 }
 0x237   :  { %v1718_v25 = vadd.f32 %v1628_v24, %v1070_v29  ;;  %v4768_v24 = vunpack.c.l.bf16 %v3492_v4 }
 0x239   :  { %2107 = vrot.lane.b32.xlu1 %v1718_v25, %s3425_s5  ;;  %2111 = vrot.lane.b32.xlu0 %v1720_v3, %s3425_s5 }
 0x23a   :  { %v1638_v23 = vpop.permute.xlu1 %1637 }
 0x23b   :  { %v1723_v58 = vadd.f32 %v1638_v23, %v1075_v39  ;;  %v4769_v23 = vunpack.c.l.bf16 %v3546_v20  ;;  %v4772_v20 = vunpack.c.l.bf16 %v3510_v11  ;;  %v4776_v11 = vunpack.c.l.bf16 %v3534_v18 }
 0x23d   :  { %2117 = vrot.lane.b32.xlu1 %v1723_v58, %s3425_s5 }
 0x23e   :  { %v1640_v30 = vpop.permute.xlu1 %1639  ;;  %v1636_v55 = vpop.permute.xlu0 %1635 }
 0x23f   :  { %v1724_v32 = vadd.f32 %v1640_v30, %v4752_v14  ;;  %v1722_v31 = vadd.f32 %v1636_v55, %v4753_v9  ;;  %v4770_v55 = vunpack.c.l.bf16 %v3532_v17  ;;  %v4771_v9 = vunpack.c.l.bf16 %v3488_v2 }
 0x240   :  { %v4773_v17 = vunpack.c.l.bf16 %v3494_v5  ;;  %v4082_v5 = vld [vmem:[%s4725_s7] ss:$0 sm:$0xff] }
 0x241   :  { %2115 = vrot.lane.b32.xlu1 %v1722_v31, %s3425_s5  ;;  %2119 = vrot.lane.b32.xlu0 %v1724_v32, %s3425_s5 }
 0x242   :  { %v1646_v29 = vpop.permute.xlu0 %1645 }
 0x243   :  { %v1727_v34 = vadd.f32 %v1646_v29, %v4754_v57 }
 0x245   :  { %2125 = vrot.lane.b32.xlu1 %v1727_v34, %s3425_s5 }
 0x246   :  { %v1648_v39 = vpop.permute.xlu0 %1647 }
 0x247   :  { %v1728_v33 = vadd.f32 %v1648_v39, %v4755_v41  ;;  %v4774_v41 = vunpack.c.l.bf16 %v3500_v7 }
 0x248   :  { %v1654_v1 = vpop.permute.xlu1 %1653 }
 0x249   :  { %v1731_v48 = vadd.f32 %v1654_v1, %v4756_v15  ;;  %2127 = vrot.lane.b32.xlu0 %v1728_v33, %s3425_s5  ;;  %v4775_v1 = vunpack.c.l.bf16 %v3514_v12 }
 0x24a   :  { %v1644_v49 = vpop.permute.xlu0 %1643 }
 0x24b   :  { %v1726_v50 = vadd.f32 %v1644_v49, %v4757_v56  ;;  %2133 = vrot.lane.b32.xlu1 %v1731_v48, %s3425_s5 }
 0x24c   :  { %v1656_v21 = vpop.permute.xlu1 %1655 }
 0x24d   :  { %v1732_v47 = vadd.f32 %v1656_v21, %v4758_v59  ;;  %2123 = vrot.lane.b32.xlu0 %v1726_v50, %s3425_s5 }
 0x24f   :  { %2135 = vrot.lane.b32.xlu1 %v1732_v47, %s3425_s5 }
 0x250   :  { %v1652_v19 = vpop.permute.xlu1 %1651  ;;  %v1662_v37 = vpop.permute.xlu0 %1661 }
 0x251   :  { %v1730_v45 = vadd.f32 %v1652_v19, %v4759_v8  ;;  %v1735_v28 = vadd.f32 %v1662_v37, %v4760_v60 }
 0x253   :  { %2131 = vrot.lane.b32.xlu0 %v1730_v45, %s3425_s5 }
 0x254   :  { %v1664_v40 = vpop.permute.xlu0 %1663 }
 0x255   :  { %v1736_v52 = vadd.f32 %v1664_v40, %v4761_v6 }
 0x257   :  { %2141 = vrot.lane.b32.xlu0 %v1735_v28, %s3425_s5 }
 0x258   :  { %v1670_v27 = vpop.permute.xlu1 %1669  ;;  %v1660_v54 = vpop.permute.xlu0 %1659 }
 0x259   :  { %v1739_v36 = vadd.f32 %v1670_v27, %v4762_v61  ;;  %v1734_v44 = vadd.f32 %v1660_v54, %v4763_v0 }
 0x25b   :  { %2149 = vrot.lane.b32.xlu1 %v1739_v36, %s3425_s5  ;;  %2143 = vrot.lane.b32.xlu0 %v1736_v52, %s3425_s5 }
 0x25c   :  { %v1672_v13 = vpop.permute.xlu1 %1671 }
 0x25d   :  { %v1740_v35 = vadd.f32 %v1672_v13, %v4764_v26 }
 0x25f   :  { %2151 = vrot.lane.b32.xlu1 %v1740_v35, %s3425_s5  ;;  %2139 = vrot.lane.b32.xlu0 %v1734_v44, %s3425_s5 }
 0x260   :  { %v1668_v10 = vpop.permute.xlu1 %1667  ;;  %v1678_v53 = vpop.permute.xlu0 %1677 }
 0x261   :  { %v1738_v22 = vadd.f32 %v1668_v10, %v4765_v43  ;;  %v1743_v58 = vadd.f32 %v1678_v53, %v4769_v23 }
 0x263   :  { %2147 = vrot.lane.b32.xlu1 %v1738_v22, %s3425_s5 }
 0x264   :  { %v1680_v46 = vpop.permute.xlu1 %1679 }
 0x265   :  { %v1744_v63 = vadd.f32 %v1680_v46, %v4766_v38 }
 0x266   :  { %v1676_v51 = vpop.permute.xlu0 %1675 }
 0x267   :  { %v1742_v16 = vadd.f32 %v1676_v51, %v4767_v42  ;;  %2159 = vrot.lane.b32.xlu1 %v1744_v63, %s3425_s5 }
 0x268   :  { %v1626_v62 = vpop.permute.xlu1 %1625 }
 0x269   :  { %v1717_v3 = vadd.f32 %v1626_v62, %v4768_v24  ;;  %2155 = vrot.lane.b32.xlu0 %v1742_v16, %s3425_s5 }
 0x26a   :  { %v1618_v25 = vpop.permute.xlu0 %1617 }
 0x26b   :  { %2105 = vrot.lane.b32.xlu1 %v1717_v3, %s3425_s5  ;;  %v1713_v31 = vadd.f32 %v1618_v25, %v4771_v9 }
 0x26c   :  { %v1642_v30 = vpop.permute.xlu1 %1641 }
 0x26d   :  { %v1725_v14 = vadd.f32 %v1642_v30, %v4770_v55  ;;  %2157 = vrot.lane.b32.xlu0 %v1743_v58, %s3425_s5 }
 0x26e   :  { %v1634_v32 = vpop.permute.xlu0 %1633 }
 0x26f   :  { %2121 = vrot.lane.b32.xlu1 %v1725_v14, %s3425_s5  ;;  %v1721_v57 = vadd.f32 %v1634_v32, %v4772_v20 }
 0x270   :  { %v1666_v4 = vpop.permute.xlu1 %1665 }
 0x271   :  { %2097 = vrot.lane.b32.xlu0 %v1713_v31, %s3425_s5  ;;  %v1737_v15 = vadd.f32 %v1666_v4, %v4775_v1 }
 0x272   :  { %v1650_v29 = vpop.permute.xlu0 %1649 }
 0x273   :  { %v1729_v39 = vadd.f32 %v1650_v29, %v4773_v17 }
 0x274   :  { %v1674_v2 = vpop.permute.xlu1 %1673 }
 0x275   :  { %2113 = vrot.lane.b32.xlu0 %v1721_v57, %s3425_s5  ;;  %v1741_v48 = vadd.f32 %v1674_v2, %v4776_v11 }
 0x276   :  { %v1658_v34 = vpop.permute.xlu0 %1657 }
 0x277   :  { %v1733_v33 = vadd.f32 %v1658_v34, %v4774_v41 }
 0x279   :  { %2129 = vrot.lane.b32.xlu0 %v1729_v39, %s3425_s5  ;;  %2137 = vrot.lane.b32.xlu1 %v1733_v33, %s3425_s5 }
 0x27d   :  { %2145 = vrot.lane.b32.xlu0 %v1737_v15, %s3425_s5  ;;  %2153 = vrot.lane.b32.xlu1 %v1741_v48, %s3425_s5 }
 0x283   :  { %v3056_v7 = vpop.f32.mrf.mxu0 }
 0x284   :  { %v1467_v49 = vadd.f32 %v3056_v7, %v4082_v5 }
 0x285   :  { %v1458_v56 = vpop.f32.mrf.mxu0 }
 0x286   :  { %v1759_v50 = vsel %vm194_vm0, %v1467_v49, -inf  ;;  %v1459_v12 = vadd.f32 %v4082_v5, %v1458_v56 }
 0x287   :  { %v1760_v21 = vrot.slane %v1759_v50, 4  ;;  %v3057_v18 = vpop.f32.mrf.mxu0 }
 0x288   :  { %v1745_v59 = vsel %vm194_vm0, %v1459_v12, -inf  ;;  %v4089_v47 = vadd.f32 %v3057_v18, %v4082_v5 }
 0x289   :  { %v1761_v19 = vmax.f32 %v1759_v50, %v1760_v21  ;;  %v1746_v37 = vrot.slane %v1745_v59, 4  ;;  %v1461_v8 = vpop.f32.mrf.mxu0 }
 0x28a   :  { %v1766_v45 = vsel %vm194_vm0, %v4089_v47, -inf  ;;  %v4094_v40 = vadd.f32 %v4082_v5, %v1461_v8 }
 0x28b   :  { %v1762_v60 = vrot.slane %v1761_v19, 2  ;;  %v1747_v28 = vmax.f32 %v1745_v59, %v1746_v37  ;;  %v1767_v27 = vrot.slane %v1766_v45, 4  ;;  %v3060_v6 = vpop.f32.mrf.mxu0 }
 0x28c   :  { %v1752_v52 = vsel %vm194_vm0, %v4094_v40, -inf  ;;  %v4099_v61 = vadd.f32 %v3060_v6, %v4082_v5 }
 0x28d   :  { %v1763_v36 = vmax.f32 %v1761_v19, %v1762_v60  ;;  %v1748_v54 = vrot.slane %v1747_v28, 2  ;;  %v1768_v13 = vmax.f32 %v1766_v45, %v1767_v27  ;;  %v1753_v0 = vrot.slane %v1752_v52, 4  ;;  %v1474_v44 = vpop.f32.mrf.mxu0 }
 0x28e   :  { %v1787_v26 = vsel %vm194_vm0, %v4099_v61, -inf  ;;  %v4104_v35 = vadd.f32 %v4082_v5, %v1474_v44 }
 0x28f   :  { %v1764_v10 = vrot.slane %v1763_v36, 1  ;;  %v1749_v43 = vmax.f32 %v1747_v28, %v1748_v54  ;;  %v1769_v22 = vrot.slane %v1768_v13, 2  ;;  %v1754_v53 = vmax.f32 %v1752_v52, %v1753_v0  ;;  %v3061_v46 = vpop.f32.mrf.mxu0 }
 0x290   :  { %v1788_v38 = vrot.slane %v1787_v26, 4  ;;  %v1773_v63 = vsel %vm194_vm0, %v4104_v35, -inf  ;;  %v4109_v51 = vadd.f32 %v3061_v46, %v4082_v5 }
 0x291   :  { %v1765_v42 = vmax.f32 %v1763_v36, %v1764_v10  ;;  %v1750_v16 = vrot.slane %v1749_v43, 1  ;;  %v1770_v62 = vmax.f32 %v1768_v13, %v1769_v22  ;;  %v1755_v24 = vrot.slane %v1754_v53, 2  ;;  %v1477_v3 = vpop.f32.mrf.mxu0 }
 0x292   :  { %v1789_v25 = vmax.f32 %v1787_v26, %v1788_v38  ;;  %v1774_v23 = vrot.slane %v1773_v63, 4  ;;  %v1794_v58 = vsel %vm194_vm0, %v4109_v51, -inf  ;;  %v4114_v30 = vadd.f32 %v4082_v5, %v1477_v3 }
 0x293   :  { %v1971_v55 = vsub.f32 %v1467_v49, %v1765_v42  ;;  %v1751_v14 = vmax.f32 %v1749_v43, %v1750_v16  ;;  %v1771_v32 = vrot.slane %v1770_v62, 1  ;;  %v1756_v9 = vmax.f32 %v1754_v53, %v1755_v24  ;;  %v3064_v31 = vpop.f32.mrf.mxu0 }
 0x294   :  { %v1790_v4 = vrot.slane %v1789_v25, 2  ;;  %v1775_v29 = vmax.f32 %v1773_v63, %v1774_v23  ;;  %v1795_v20 = vrot.slane %v1794_v58, 4  ;;  %v1780_v57 = vsel %vm194_vm0, %v4114_v30, -inf }
 0x295   :  { %v2005_v34 = vmul.f32 1.442695, %v1971_v55  ;;  %v1969_v17 = vsub.f32 %v1459_v12, %v1751_v14  ;;  %v1772_v39 = vmax.f32 %v1770_v62, %v1771_v32  ;;  %v1757_v41 = vrot.slane %v1756_v9, 1  ;;  %v1490_v33 = vpop.f32.mrf.mxu0 }
 0x296   :  { %v1791_v2 = vmax.f32 %v1789_v25, %v1790_v4  ;;  %v1776_v1 = vrot.slane %v1775_v29, 2  ;;  %v1796_v15 = vmax.f32 %v1794_v58, %v1795_v20  ;;  %v1781_v11 = vrot.slane %v1780_v57, 4 }
 0x297   :  { %3224 = vpow2.f32 %v2005_v34  ;;  %v2001_v48 = vmul.f32 1.442695, %v1969_v17  ;;  %v1972_v7 = vsub.f32 %v4089_v47, %v1772_v39  ;;  %v1758_v49 = vmax.f32 %v1756_v9, %v1757_v41  ;;  %v3065_v59 = vpop.f32.mrf.mxu0 }
 0x298   :  { %v1792_v56 = vrot.slane %v1791_v2, 1  ;;  %v1777_v50 = vmax.f32 %v1775_v29, %v1776_v1  ;;  %v1797_v21 = vrot.slane %v1796_v15, 2  ;;  %v1782_v18 = vmax.f32 %v1780_v57, %v1781_v11 }
 0x299   :  { %3226 = vpow2.f32 %v2001_v48  ;;  %v2007_v19 = vmul.f32 1.442695, %v1972_v7  ;;  %v1970_v12 = vsub.f32 %v4094_v40, %v1758_v49  ;;  %v4121_v37 = vadd.f32 %v3064_v31, %v4082_v5  ;;  %v1493_v13 = vpop.f32.mrf.mxu0 }
 0x29a   :  { %v1793_v8 = vmax.f32 %v1791_v2, %v1792_v56  ;;  %v1778_v45 = vrot.slane %v1777_v50, 1  ;;  %v1798_v60 = vmax.f32 %v1796_v15, %v1797_v21  ;;  %v1783_v28 = vrot.slane %v1782_v18, 2 }
 0x29b   :  { %3228 = vpow2.f32 %v2007_v19  ;;  %v2003_v27 = vmul.f32 1.442695, %v1970_v12  ;;  %v1815_v47 = vsel %vm194_vm0, %v4121_v37, -inf  ;;  %v4126_v6 = vadd.f32 %v4082_v5, %v1490_v33  ;;  %v3068_v1 = vpop.f32.mrf.mxu0 }
 0x29c   :  { %v1975_v52 = vsub.f32 %v4099_v61, %v1793_v8  ;;  %v1779_v36 = vmax.f32 %v1777_v50, %v1778_v45  ;;  %v1799_v54 = vrot.slane %v1798_v60, 1  ;;  %v1784_v40 = vmax.f32 %v1782_v18, %v1783_v28 }
 0x29d   :  { %3230 = vpow2.f32 %v2003_v27  ;;  %v1816_v0 = vrot.slane %v1815_v47, 4  ;;  %v1801_v44 = vsel %vm194_vm0, %v4126_v6, -inf  ;;  %v4132_v26 = vadd.f32 %v3065_v59, %v4082_v5 }
 0x29e   :  { %v2013_v10 = vmul.f32 1.442695, %v1975_v52  ;;  %v1973_v43 = vsub.f32 %v4104_v35, %v1779_v36  ;;  %v1800_v22 = vmax.f32 %v1798_v60, %v1799_v54  ;;  %v1785_v53 = vrot.slane %v1784_v40, 1 }
 0x29f   :  { %v1817_v46 = vmax.f32 %v1815_v47, %v1816_v0  ;;  %v1802_v38 = vrot.slane %v1801_v44, 4  ;;  %v1822_v61 = vsel %vm194_vm0, %v4132_v26, -inf  ;;  %v4138_v63 = vadd.f32 %v4082_v5, %v1493_v13 }
 0x2a0   :  { %3232 = vpow2.f32 %v2013_v10  ;;  %v2009_v42 = vmul.f32 1.442695, %v1973_v43  ;;  %v1976_v16 = vsub.f32 %v4109_v51, %v1800_v22  ;;  %v1786_v62 = vmax.f32 %v1784_v40, %v1785_v53 }
 0x2a1   :  { %v1818_v24 = vrot.slane %v1817_v46, 2  ;;  %v1803_v3 = vmax.f32 %v1801_v44, %v1802_v38  ;;  %v1823_v25 = vrot.slane %v1822_v61, 4  ;;  %v1808_v35 = vsel %vm194_vm0, %v4138_v63, -inf }
 0x2a2   :  { %v2015_v23 = vmul.f32 1.442695, %v1976_v16  ;;  %v1974_v58 = vsub.f32 %v4114_v30, %v1786_v62  ;;  %v1809_v55 = vrot.slane %v1808_v35, 4  ;;  %3234 = vpow2.f32 %v2009_v42 }
 0x2a3   :  { %v1819_v14 = vmax.f32 %v1817_v46, %v1818_v24  ;;  %v1804_v32 = vrot.slane %v1803_v3, 2  ;;  %v1824_v9 = vmax.f32 %v1822_v61, %v1823_v25  ;;  %v4158_v59 = vadd.f32 %v3068_v1, %v4082_v5 }
 0x2a4   :  { %v4144_v31 = vpop.eup %3224  ;;  %v1810_v4 = vmax.f32 %v1808_v35, %v1809_v55  ;;  %3236 = vpow2.f32 %v2015_v23  ;;  %v2011_v17 = vmul.f32 1.442695, %v1974_v58 }
 0x2a5   :  { %v1820_v51 = vrot.slane %v1819_v14, 1  ;;  %v1805_v29 = vmax.f32 %v1803_v3, %v1804_v32  ;;  %v1825_v20 = vrot.slane %v1824_v9, 2  ;;  %v2463_v34 = vsel %vm194_vm0, %v4144_v31, 0.0  ;;  %v1506_v3 = vpop.f32.mrf.mxu0 }
 0x2a6   :  { %v4146_v57 = vpop.eup %3226  ;;  %v1811_v39 = vrot.slane %v1810_v4, 2  ;;  %v2464_v48 = vrot.slane %v2463_v34, 4  ;;  %3238 = vpow2.f32 %v2011_v17  ;;  %v1843_v54 = vsel %vm194_vm0, %v4158_v59, -inf }
 0x2a7   :  { %v2449_v30 = vsel %vm194_vm0, %v4146_v57, 0.0  ;;  %v1821_v41 = vmax.f32 %v1819_v14, %v1820_v51  ;;  %v1806_v33 = vrot.slane %v1805_v29, 1  ;;  %v1826_v2 = vmax.f32 %v1824_v9, %v1825_v20 }
 0x2a8   :  { %v4152_v15 = vpop.eup %3228  ;;  %v1812_v11 = vmax.f32 %v1810_v4, %v1811_v39  ;;  %v2450_v21 = vrot.slane %v2449_v30, 4  ;;  %v2465_v28 = vadd.f32 %v2464_v48, %v2463_v34  ;;  %v1844_v43 = vrot.slane %v1843_v54, 4 }
 0x2a9   :  { %v1979_v7 = vsub.f32 %v4121_v37, %v1821_v41  ;;  %v1807_v49 = vmax.f32 %v1805_v29, %v1806_v33  ;;  %v1827_v56 = vrot.slane %v1826_v2, 1  ;;  %v2470_v19 = vsel %vm194_vm0, %v4152_v15, 0.0 }
 0x2aa   :  { %v4155_v50 = vpop.eup %3230  ;;  %v1813_v18 = vrot.slane %v1812_v11, 1  ;;  %v2471_v52 = vrot.slane %v2470_v19, 4  ;;  %v2451_v40 = vadd.f32 %v2450_v21, %v2449_v30  ;;  %v2466_v44 = vrot.slane %v2465_v28, 2 }
 0x2ab   :  { %v2021_v12 = vmul.f32 1.442695, %v1979_v7  ;;  %v1977_v8 = vsub.f32 %v4126_v6, %v1807_v49  ;;  %v1828_v45 = vmax.f32 %v1826_v2, %v1827_v56  ;;  %v2456_v37 = vsel %vm194_vm0, %v4155_v50, 0.0 }
 0x2ac   :  { %v1814_v36 = vmax.f32 %v1812_v11, %v1813_v18  ;;  %v2457_v13 = vrot.slane %v2456_v37, 4  ;;  %v2452_v46 = vrot.slane %v2451_v40, 2  ;;  %v2467_v16 = vadd.f32 %v2466_v44, %v2465_v28 }
 0x2ad   :  { %v4165_v60 = vpop.eup %3232  ;;  %v2017_v27 = vmul.f32 1.442695, %v1977_v8  ;;  %v1980_v47 = vsub.f32 %v4132_v26, %v1828_v45  ;;  %3240 = vpow2.f32 %v2021_v12  ;;  %v2472_v26 = vadd.f32 %v2471_v52, %v2470_v19 }
 0x2ae   :  { %v2491_v6 = vsel %vm194_vm0, %v4165_v60, 0.0  ;;  %v1978_v53 = vsub.f32 %v4138_v63, %v1814_v36  ;;  %v2458_v38 = vadd.f32 %v2457_v13, %v2456_v37  ;;  %v1845_v24 = vmax.f32 %v1843_v54, %v1844_v43  ;;  %v2102_v37 = vpop.permute.xlu1 %2101 }
 0x2af   :  { %v4170_v0 = vpop.eup %3234  ;;  %3242 = vpow2.f32 %v2017_v27  ;;  %v2023_v10 = vmul.f32 1.442695, %v1980_v47  ;;  %v2492_v61 = vrot.slane %v2491_v6, 4  ;;  %v2473_v25 = vrot.slane %v2472_v26, 2 }
 0x2b0   :  { %v2477_v42 = vsel %vm194_vm0, %v4170_v0, 0.0  ;;  %v2019_v23 = vmul.f32 1.442695, %v1978_v53  ;;  %v2453_v55 = vadd.f32 %v2452_v46, %v2451_v40  ;;  %v2459_v63 = vrot.slane %v2458_v38, 2  ;;  %v3069_v40 = vpop.f32.mrf.mxu0 }
 0x2b1   :  { %v4174_v22 = vpop.eup %3236  ;;  %3244 = vpow2.f32 %v2023_v10  ;;  %v2478_v35 = vrot.slane %v2477_v42, 4  ;;  %v2493_v14 = vadd.f32 %v2492_v61, %v2491_v6  ;;  %v1846_v32 = vrot.slane %v1845_v24, 2 }
 0x2b2   :  { %v2498_v62 = vsel %vm194_vm0, %v4174_v22, 0.0  ;;  %v4184_v4 = vadd.f32 %v4082_v5, %v1506_v3  ;;  %v2468_v51 = vrot.slane %v2467_v16, 1  ;;  %v2474_v20 = vadd.f32 %v2473_v25, %v2472_v26  ;;  %v1509_v3 = vpop.f32.mrf.mxu0 }
 0x2b3   :  { %v4181_v58 = vpop.eup %3238  ;;  %v2499_v9 = vrot.slane %v2498_v62, 4  ;;  %v1847_v29 = vmax.f32 %v1845_v24, %v1846_v32  ;;  %v2479_v34 = vadd.f32 %v2478_v35, %v2477_v42  ;;  %3246 = vpow2.f32 %v2019_v23 }
 0x2b4   :  { %v2484_v17 = vsel %vm194_vm0, %v4181_v58, 0.0  ;;  %v2454_v30 = vrot.slane %v2453_v55, 1  ;;  %v2460_v41 = vadd.f32 %v2459_v63, %v2458_v38  ;;  %v2494_v33 = vrot.slane %v2493_v14, 2 }
 0x2b5   :  { %v1848_v2 = vrot.slane %v1847_v29, 1  ;;  %v2500_v1 = vadd.f32 %v2499_v9, %v2498_v62  ;;  %v1829_v11 = vsel %vm194_vm0, %v4184_v4, -inf  ;;  %v2469_v48 = vadd.f32 %v2468_v51, %v2467_v16 }
 0x2b6   :  { %v2485_v7 = vrot.slane %v2484_v17, 4  ;;  %v2475_v56 = vrot.slane %v2474_v20, 1  ;;  %v2480_v21 = vrot.slane %v2479_v34, 2  ;;  %v2455_v12 = vadd.f32 %v2454_v30, %v2453_v55 }
 0x2b7   :  { %v1849_v19 = vmax.f32 %v1847_v29, %v1848_v2  ;;  %v2461_v8 = vrot.slane %v2460_v41, 1  ;;  %v2495_v45 = vadd.f32 %v2494_v33, %v2493_v14  ;;  %v1830_v28 = vrot.slane %v1829_v11, 4 }
 0x2b8   :  { %v2501_v27 = vrot.slane %v2500_v1, 2  ;;  %v2195_v47 = vmul.f32 %v4144_v31, %v2102_v37  ;;  %v2486_v52 = vadd.f32 %v2485_v7, %v2484_v17  ;;  %3248 = vrcp.f32 %v2469_v48 }
 0x2b9   :  { %v2476_v6 = vadd.f32 %v2475_v56, %v2474_v20  ;;  %v2481_v44 = vadd.f32 %v2480_v21, %v2479_v34  ;;  %v1983_v10 = vsub.f32 %v4158_v59, %v1849_v19  ;;  %3250 = vrcp.f32 %v2455_v12 }
 0x2ba   :  { %v4188_v39 = vpop.eup %3240  ;;  %v2462_v43 = vadd.f32 %v2461_v8, %v2460_v41  ;;  %v2496_v26 = vrot.slane %v2495_v45, 1  ;;  %v1831_v53 = vmax.f32 %v1829_v11, %v1830_v28  ;;  %v2502_v46 = vadd.f32 %v2501_v27, %v2500_v1  ;;  %v3072_v41 = vpop.f32.mrf.mxu0 }
 0x2bb   :  { %v2519_v18 = vsel %vm194_vm0, %v4188_v39, 0.0  ;;  %v2239_v31 = vsel %vm194_vm0, %v2195_v47, 0.0  ;;  %v4204_v61 = vadd.f32 %v3069_v40, %v4082_v5  ;;  %v2487_v42 = vrot.slane %v2486_v52, 2 }
 0x2bc   :  { %v4192_v49 = vpop.eup %3242  ;;  %v2520_v36 = vrot.slane %v2519_v18, 4  ;;  %v1832_v24 = vrot.slane %v1831_v53, 2  ;;  %3252 = vrcp.f32 %v2476_v6  ;;  %v2482_v59 = vrot.slane %v2481_v44, 1  ;;  %v1522_v28 = vpop.f32.mrf.mxu0 }
 0x2bd   :  { %v2505_v54 = vsel %vm194_vm0, %v4192_v49, 0.0  ;;  %v2029_v25 = vmul.f32 1.442695, %v1983_v10  ;;  %v1850_v35 = vsel %vm194_vm0, %v4204_v61, -inf  ;;  %v2497_v55 = vadd.f32 %v2496_v26, %v2495_v45 }
 0x2be   :  { %v4199_v13 = vpop.eup %3244  ;;  %v2506_v38 = vrot.slane %v2505_v54, 4  ;;  %v2521_v16 = vadd.f32 %v2520_v36, %v2519_v18  ;;  %v2240_v63 = vrot.slane %v2239_v31, 4  ;;  %v1833_v14 = vmax.f32 %v1831_v53, %v1832_v24 }
 0x2bf   :  { %v2526_v62 = vsel %vm194_vm0, %v4199_v13, 0.0  ;;  %v1851_v32 = vrot.slane %v1850_v35, 4  ;;  %3254 = vrcp.f32 %v2462_v43  ;;  %v2503_v9 = vrot.slane %v2502_v46, 1 }
 0x2c0   :  { %v4210_v23 = vpop.eup %3246  ;;  %v2507_v51 = vadd.f32 %v2506_v38, %v2505_v54  ;;  %v2527_v29 = vrot.slane %v2526_v62, 4  ;;  %v2488_v20 = vadd.f32 %v2487_v42, %v2486_v52  ;;  %v2522_v34 = vrot.slane %v2521_v16, 2 }
 0x2c1   :  { %v1834_v17 = vrot.slane %v1833_v14, 1  ;;  %v1852_v30 = vmax.f32 %v1850_v35, %v1851_v32  ;;  %v2483_v33 = vadd.f32 %v2482_v59, %v2481_v44  ;;  %v2512_v2 = vsel %vm194_vm0, %v4210_v23, 0.0  ;;  %v3073_v59 = vpop.f32.mrf.mxu0 }
 0x2c2   :  { %3256 = vpow2.f32 %v2029_v25  ;;  %v4215_v1 = vadd.f32 %v4082_v5, %v1509_v3  ;;  %v2241_v11 = vadd.f32 %v2240_v63, %v2239_v31  ;;  %v2508_v56 = vrot.slane %v2507_v51, 2 }
 0x2c3   :  { %3258 = vrcp.f32 %v2497_v55  ;;  %v1835_v48 = vmax.f32 %v1833_v14, %v1834_v17  ;;  %v1853_v7 = vrot.slane %v1852_v30, 2  ;;  %v2528_v21 = vadd.f32 %v2527_v29, %v2526_v62  ;;  %v2104_v62 = vpop.permute.xlu1 %2103  ;;  %v2100_v14 = vpop.permute.xlu0 %2099 }
 0x2c4   :  { %v1836_v18 = vsel %vm194_vm0, %v4215_v1, -inf  ;;  %v4220_v19 = vadd.f32 %v3072_v41, %v4082_v5  ;;  %v2489_v12 = vrot.slane %v2488_v20, 1  ;;  %v2523_v8 = vadd.f32 %v2522_v34, %v2521_v16 }
 0x2c5   :  { %v2513_v45 = vrot.slane %v2512_v2, 4  ;;  %v1854_v37 = vmax.f32 %v1852_v30, %v1853_v7  ;;  %3260 = vrcp.f32 %v2483_v33  ;;  %v2504_v27 = vadd.f32 %v2503_v9, %v2502_v46  ;;  %v4224_v36 = vpop.eup %3248 }
 0x2c6   :  { %v1837_v47 = vrot.slane %v1836_v18, 4  ;;  %v1871_v52 = vsel %vm194_vm0, %v4220_v19, -inf  ;;  %v2242_v54 = vrot.slane %v2241_v11, 2  ;;  %v1981_v40 = vsub.f32 %v4184_v4, %v1835_v48  ;;  %v4227_v10 = vpop.eup %3250 }
 0x2c7   :  { %v1855_v6 = vrot.slane %v1854_v37, 1  ;;  %v1872_v44 = vrot.slane %v1871_v52, 4  ;;  %v2509_v43 = vadd.f32 %v2508_v56, %v2507_v51  ;;  %v2529_v26 = vrot.slane %v2528_v21, 2 }
 0x2c8   :  { %v1838_v53 = vmax.f32 %v1836_v18, %v1837_v47  ;;  %v4230_v38 = vadd.f32 %v4082_v5, %v1522_v28  ;;  %v2490_v46 = vadd.f32 %v2489_v12, %v2488_v20  ;;  %v2524_v31 = vrot.slane %v2523_v8, 1  ;;  %v2110_v47 = vpop.permute.xlu0 %2109 }
 0x2c9   :  { %v2514_v42 = vadd.f32 %v2513_v45, %v2512_v2  ;;  %v1856_v16 = vmax.f32 %v1854_v37, %v1855_v6  ;;  %3262 = vrcp.f32 %v2504_v27  ;;  %v2196_v24 = vmul.f32 %v4152_v15, %v2104_v62  ;;  %v4233_v25 = vpop.eup %3252 }
 0x2ca   :  { %v1839_v3 = vrot.slane %v1838_v53, 2  ;;  %v1873_v4 = vmax.f32 %v1871_v52, %v1872_v44  ;;  %v4235_v35 = vadd.f32 %v2242_v54, %v2241_v11  ;;  %v2025_v55 = vmul.f32 1.442695, %v1981_v40  ;;  %v1525_v11 = vpop.f32.mrf.mxu0 }
 0x2cb   :  { %v1984_v63 = vsub.f32 %v4204_v61, %v1856_v16  ;;  %v1857_v32 = vsel %vm194_vm0, %v4230_v38, -inf  ;;  %v2510_v9 = vrot.slane %v2509_v43, 1  ;;  %v2530_v51 = vadd.f32 %v2529_v26, %v2528_v21 }
 0x2cc   :  { %v1840_v29 = vmax.f32 %v1838_v53, %v1839_v3  ;;  %v1874_v20 = vrot.slane %v1873_v4, 2  ;;  %v4240_v34 = vpop.eup %3254  ;;  %3264 = vrcp.f32 %v2490_v46  ;;  %v2525_v15 = vadd.f32 %v2524_v31, %v2523_v8  ;;  %v3076_v3 = vpop.f32.mrf.mxu0 }
 0x2cd   :  { %v2515_v17 = vrot.slane %v2514_v42, 2  ;;  %v1858_v30 = vrot.slane %v1857_v32, 4  ;;  %v2246_v41 = vsel %vm194_vm0, %v2196_v24, 0.0  ;;  %v2194_v2 = vmul.f32 %v4155_v50, %v2100_v14 }
 0x2ce   :  { %v1841_v33 = vrot.slane %v1840_v29, 1  ;;  %v1875_v61 = vmax.f32 %v1873_v4, %v1874_v20  ;;  %3266 = vpow2.f32 %v2025_v55  ;;  %v2031_v7 = vmul.f32 1.442695, %v1984_v63 }
 0x2cf   :  { %v4244_v48 = vpop.eup %3256  ;;  %v1859_v56 = vmax.f32 %v1857_v32, %v1858_v30  ;;  %v4247_v21 = vadd.f32 %v3073_v59, %v4082_v5  ;;  %v2511_v12 = vadd.f32 %v2510_v9, %v2509_v43  ;;  %v2531_v8 = vrot.slane %v2530_v51, 1  ;;  %v1538_v30 = vpop.f32.mrf.mxu0 }
 0x2d0   :  { %v4249_v18 = vpop.eup %3258  ;;  %v1842_v45 = vmax.f32 %v1840_v29, %v1841_v33  ;;  %v1876_v37 = vrot.slane %v1875_v61, 1  ;;  %v2247_v28 = vrot.slane %v2246_v41, 4  ;;  %v4254_v52 = vadd.f32 %v4082_v5, %v1525_v11 }
 0x2d1   :  { %v1860_v27 = vrot.slane %v1859_v56, 2  ;;  %v1878_v50 = vsel %vm194_vm0, %v4247_v21, -inf  ;;  %v2547_v54 = vsel %vm194_vm0, %v4244_v48, 0.0  ;;  %v2232_v40 = vsel %vm194_vm0, %v2194_v2, 0.0 }
 0x2d2   :  { %v1877_v6 = vmax.f32 %v1875_v61, %v1876_v37  ;;  %v2199_v44 = vmul.f32 %v4165_v60, %v2110_v47  ;;  %v4260_v43 = vpop.eup %3260  ;;  %3268 = vpow2.f32 %v2031_v7  ;;  %v1879_v53 = vrot.slane %v1878_v50, 4 }
 0x2d3   :  { %v1861_v26 = vmax.f32 %v1859_v56, %v1860_v27  ;;  %v1864_v46 = vsel %vm194_vm0, %v4254_v52, -inf  ;;  %v2532_v31 = vadd.f32 %v2531_v8, %v2530_v51  ;;  %v4264_v16 = vadd.f32 %v2515_v17, %v2514_v42  ;;  %v2108_v56 = vpop.permute.xlu1 %2107 }
 0x2d4   :  { %v1982_v62 = vsub.f32 %v4215_v1, %v1842_v45  ;;  %v1865_v24 = vrot.slane %v1864_v46, 4  ;;  %v2248_v4 = vadd.f32 %v2247_v28, %v2246_v41  ;;  %v1987_v59 = vsub.f32 %v4220_v19, %v1877_v6 }
 0x2d5   :  { %v1862_v55 = vrot.slane %v1861_v26, 1  ;;  %v1880_v60 = vmax.f32 %v1878_v50, %v1879_v53  ;;  %3270 = vrcp.f32 %v2525_v15  ;;  %v2548_v63 = vrot.slane %v2547_v54, 4 }
 0x2d6   :  { %v2233_v14 = vrot.slane %v2232_v40, 4  ;;  %v1866_v32 = vmax.f32 %v1864_v46, %v1865_v24  ;;  %v4268_v9 = vpop.eup %3262  ;;  %3272 = vrcp.f32 %v2511_v12  ;;  %v2244_v51 = vrot.slane %v4235_v35, 1 }
 0x2d7   :  { %v2267_v42 = vsel %vm194_vm0, %v2199_v44, 0.0  ;;  %v2027_v29 = vmul.f32 1.442695, %v1982_v62  ;;  %v1863_v1 = vmax.f32 %v1861_v26, %v1862_v55  ;;  %v1881_v20 = vrot.slane %v1880_v60, 2 }
 0x2d8   :  { %v1867_v17 = vrot.slane %v1866_v32, 2  ;;  %3274 = vrcp.f32 %v2532_v31  ;;  %v2517_v19 = vrot.slane %v4264_v16, 1  ;;  %v2249_v41 = vrot.slane %v2248_v4, 2 }
 0x2d9   :  { %v2037_v15 = vmul.f32 1.442695, %v1987_v59  ;;  %v4273_v33 = vpop.eup %3264  ;;  %v2549_v2 = vadd.f32 %v2548_v63, %v2547_v54  ;;  %v2234_v61 = vadd.f32 %v2233_v14, %v2232_v40  ;;  %v1882_v11 = vmax.f32 %v1880_v60, %v1881_v20  ;;  %v2112_v54 = vpop.permute.xlu0 %2111 }
 0x2da   :  { %v1868_v7 = vmax.f32 %v1866_v32, %v1867_v17  ;;  %v2268_v12 = vrot.slane %v2267_v42, 4  ;;  %v2198_v8 = vmul.f32 %v4181_v58, %v2108_v56  ;;  %v4277_v45 = vadd.f32 %v3076_v3, %v4082_v5 }
 0x2db   :  { %v4280_v37 = vadd.f32 %v4082_v5, %v1538_v30  ;;  %v4282_v28 = vpop.eup %3266  ;;  %3276 = vpow2.f32 %v2027_v29  ;;  %v1985_v27 = vsub.f32 %v4230_v38, %v1863_v1  ;;  %v1883_v47 = vrot.slane %v1882_v11, 1 }
 0x2dc   :  { %v1869_v50 = vrot.slane %v1868_v7, 1  ;;  %v2250_v40 = vadd.f32 %v2249_v41, %v2248_v4  ;;  %3278 = vpow2.f32 %v2037_v15  ;;  %v2200_v6 = vmul.f32 %v4174_v22, %v2112_v54 }
 0x2dd   :  { %v1899_v58 = vsel %vm194_vm0, %v4277_v45, -inf  ;;  %v2550_v44 = vrot.slane %v2549_v2, 2  ;;  %v2235_v26 = vrot.slane %v2234_v61, 2  ;;  %v1884_v53 = vmax.f32 %v1882_v11, %v1883_v47 }
 0x2de   :  { %v1870_v46 = vmax.f32 %v1868_v7, %v1869_v50  ;;  %v2533_v31 = vsel %vm194_vm0, %v4282_v28, 0.0  ;;  %v2269_v62 = vadd.f32 %v2268_v12, %v2267_v42  ;;  %v1900_v24 = vrot.slane %v1899_v58, 4  ;;  %v3077_v12 = vpop.f32.mrf.mxu0 }
 0x2df   :  { %v1885_v38 = vsel %vm194_vm0, %v4280_v37, -inf  ;;  %v4292_v3 = vpop.eup %3268  ;;  %v2033_v4 = vmul.f32 1.442695, %v1985_v27  ;;  %v1988_v22 = vsub.f32 %v4247_v21, %v1884_v53  ;;  %v2260_v55 = vsel %vm194_vm0, %v2198_v8, 0.0 }
 0x2e0   :  { %v1986_v59 = vsub.f32 %v4254_v52, %v1870_v46  ;;  %v2251_v60 = vrot.slane %v2250_v40, 1  ;;  %v2274_v63 = vsel %vm194_vm0, %v2200_v6, 0.0  ;;  %v1901_v14 = vmax.f32 %v1899_v58, %v1900_v24 }
 0x2e1   :  { %v1886_v32 = vrot.slane %v1885_v38, 4  ;;  %v2551_v29 = vadd.f32 %v2550_v44, %v2549_v2  ;;  %v2534_v42 = vrot.slane %v2533_v31, 4  ;;  %v2236_v1 = vadd.f32 %v2235_v26, %v2234_v61 }
 0x2e2   :  { %v2039_v20 = vmul.f32 1.442695, %v1988_v22  ;;  %v4298_v17 = vpop.eup %3270  ;;  %v2554_v30 = vsel %vm194_vm0, %v4292_v3, 0.0  ;;  %v2270_v41 = vrot.slane %v2269_v62, 2  ;;  %v2261_v21 = vrot.slane %v2260_v55, 4  ;;  %v1541_v22 = vpop.f32.mrf.mxu0 }
 0x2e3   :  { %v1902_v15 = vrot.slane %v1901_v14, 2  ;;  %v4302_v52 = vpop.eup %3272  ;;  %3280 = vpow2.f32 %v2033_v4  ;;  %v2035_v11 = vmul.f32 1.442695, %v1986_v59  ;;  %v2275_v7 = vrot.slane %v2274_v63, 4 }
 0x2e4   :  { %v1887_v56 = vmax.f32 %v1885_v38, %v1886_v32  ;;  %v2518_v2 = vadd.f32 %v2517_v19, %v4264_v16  ;;  %v2245_v61 = vadd.f32 %v2244_v51, %v4235_v35  ;;  %3282 = vpow2.f32 %v2039_v20 }
 0x2e5   :  { %v4308_v8 = vpop.eup %3274  ;;  %v2535_v27 = vadd.f32 %v2534_v42, %v2533_v31  ;;  %v2555_v47 = vrot.slane %v2554_v30, 4  ;;  %v2252_v50 = vadd.f32 %v2251_v60, %v2250_v40  ;;  %v2237_v54 = vrot.slane %v2236_v1, 1 }
 0x2e6   :  { %v2552_v6 = vrot.slane %v2551_v29, 1  ;;  %v2262_v58 = vadd.f32 %v2261_v21, %v2260_v55  ;;  %v1903_v44 = vmax.f32 %v1901_v14, %v1902_v15  ;;  %v4311_v26 = vadd.f32 %v3077_v12, %v4082_v5 }
 0x2e7   :  { %v2271_v53 = vadd.f32 %v2270_v41, %v2269_v62  ;;  %3284 = vpow2.f32 %v2035_v11  ;;  %v2276_v16 = vadd.f32 %v2275_v7, %v2274_v63  ;;  %v1888_v19 = vrot.slane %v1887_v56, 2 }
 0x2e8   :  { %v4313_v46 = vpop.eup %3276  ;;  %3286 = vrcp.f32 %v2518_v2  ;;  %v4316_v35 = vmul.f32 %v4224_v36, %v2245_v61  ;;  %v1904_v51 = vrot.slane %v1903_v44, 1  ;;  %v2536_v40 = vrot.slane %v2535_v27, 2 }
 0x2e9   :  { %v4318_v31 = vpop.eup %3278  ;;  %v2556_v24 = vadd.f32 %v2555_v47, %v2554_v30  ;;  %v4321_v38 = vmul.f32 %v4233_v25, %v2252_v50  ;;  %v1889_v4 = vmax.f32 %v1887_v56, %v1888_v19  ;;  %v2238_v62 = vadd.f32 %v2237_v54, %v2236_v1  ;;  %v2118_v25 = vpop.permute.xlu1 %2117 }
 0x2ea   :  { %4777 = vst [vmem:[#allocation11_spill] sm:$0xff] %v4316_v35  ;;  %v2263_v59 = vrot.slane %v2262_v58, 2  ;;  %v1905_v55 = vmax.f32 %v1903_v44, %v1904_v51  ;;  %v1906_v60 = vsel %vm194_vm0, %v4311_v26, -inf  ;;  %v2553_v63 = vadd.f32 %v2552_v6, %v2551_v29 }
 0x2eb   :  { %v2272_v14 = vrot.slane %v2271_v53, 1  ;;  %v2277_v36 = vrot.slane %v2276_v16, 2  ;;  %v1890_v32 = vrot.slane %v1889_v4, 1  ;;  %v2540_v42 = vsel %vm194_vm0, %v4313_v46, 0.0 }
 0x2ec   :  { %v2575_v20 = vsel %vm194_vm0, %v4318_v31, 0.0  ;;  %v1907_v30 = vrot.slane %v1906_v60, 4  ;;  %v4330_v41 = vadd.f32 %v4082_v5, %v1541_v22  ;;  %v2537_v1 = vadd.f32 %v2536_v40, %v2535_v27 }
 0x2ed   :  { %v2557_v21 = vrot.slane %v2556_v24, 2  ;;  %v1991_v15 = vsub.f32 %v4277_v45, %v1905_v55  ;;  %v2203_v29 = vmul.f32 %v4188_v39, %v2118_v25  ;;  %v2264_v11 = vadd.f32 %v2263_v59, %v2262_v58 }
 0x2ee   :  { %v1891_v7 = vmax.f32 %v1889_v4, %v1890_v32  ;;  %v1908_v56 = vmax.f32 %v1906_v60, %v1907_v30  ;;  %v1892_v12 = vsel %vm194_vm0, %v4330_v41, -inf  ;;  %v2541_v2 = vrot.slane %v2540_v42, 4 }
 0x2ef   :  { %v4337_v61 = vmul.f32 %v4240_v34, %v2238_v62  ;;  %v2576_v47 = vrot.slane %v2575_v20, 4  ;;  %v2278_v50 = vadd.f32 %v2277_v36, %v2276_v16  ;;  %3288 = vrcp.f32 %v2553_v63  ;;  %v3080_v62 = vpop.f32.mrf.mxu0 }
 0x2f0   :  { %v4339_v54 = vpop.eup %3280  ;;  %v2273_v27 = vadd.f32 %v2272_v14, %v2271_v53  ;;  %v1909_v6 = vrot.slane %v1908_v56, 2  ;;  %v1893_v45 = vrot.slane %v1892_v12, 4  ;;  %v2538_v39 = vrot.slane %v2537_v1, 1 }
 0x2f1   :  { %v4341_v44 = vpop.eup %3282  ;;  %v2558_v58 = vadd.f32 %v2557_v21, %v2556_v24  ;;  %v2045_v19 = vmul.f32 1.442695, %v1991_v15  ;;  %v2295_v51 = vsel %vm194_vm0, %v2203_v29, 0.0  ;;  %v2265_v40 = vrot.slane %v2264_v11, 1  ;;  %v1554_v29 = vpop.f32.mrf.mxu0 }
 0x2f2   :  { %v1989_v4 = vsub.f32 %v4280_v37, %v1891_v7  ;;  %v1910_v34 = vmax.f32 %v1908_v56, %v1909_v6  ;;  %v1894_v22 = vmax.f32 %v1892_v12, %v1893_v45  ;;  %v2542_v16 = vadd.f32 %v2541_v2, %v2540_v42 }
 0x2f3   :  { %v2577_v59 = vadd.f32 %v2576_v47, %v2575_v20  ;;  %v2561_v53 = vsel %vm194_vm0, %v4339_v54, 0.0  ;;  %v2279_v55 = vrot.slane %v2278_v50, 1  ;;  %v2582_v24 = vsel %vm194_vm0, %v4341_v44, 0.0 }
 0x2f4   :  { %v4347_v60 = vpop.eup %3284  ;;  %v2296_v63 = vrot.slane %v2295_v51, 4  ;;  %v1911_v14 = vrot.slane %v1910_v34, 1  ;;  %v1895_v36 = vrot.slane %v1894_v22, 2  ;;  %v2539_v37 = vadd.f32 %v2538_v39, %v2537_v1 }
 0x2f5   :  { %v4351_v32 = vpop.eup %3286  ;;  %v2559_v25 = vrot.slane %v2558_v58, 1  ;;  %v4354_v30 = vmul.f32 %v4249_v18, %v2273_v27  ;;  %3290 = vpow2.f32 %v2045_v19  ;;  %v2562_v42 = vrot.slane %v2561_v53, 4  ;;  %v4366_v19 = vld [vmem:[%s4725_s7] ss:$0 sm:$0xff]  ;;  %s3426_s7 = smov [#allocation7]  }
 0x2f6   :  { %v2041_v20 = vmul.f32 1.442695, %v1989_v4  ;;  %v1912_v21 = vmax.f32 %v1910_v34, %v1911_v14  ;;  %v1896_v15 = vmax.f32 %v1894_v22, %v1895_v36  ;;  %v2543_v7 = vrot.slane %v2542_v16, 2  ;;  %v2120_v14 = vpop.permute.xlu0 %2119 }
 0x2f7   :  { %4778 = vst [vmem:[#allocation12_spill] sm:$0xff] %v4354_v30  ;;  %v2583_v56 = vrot.slane %v2582_v24, 4  ;;  %v2568_v12 = vsel %vm194_vm0, %v4347_v60, 0.0  ;;  %v2266_v2 = vadd.f32 %v2265_v40, %v2264_v11  ;;  %v2578_v47 = vrot.slane %v2577_v59, 2 }
 0x2f8   :  { %v2280_v6 = vadd.f32 %v2279_v55, %v2278_v50  ;;  %v2297_v1 = vadd.f32 %v2296_v63, %v2295_v51  ;;  %v1897_v45 = vrot.slane %v1896_v15, 1  ;;  %v1992_v27 = vsub.f32 %v4311_v26, %v1912_v21 }
 0x2f9   :  { %v2710_v18 = vmul.f32 %v4273_v33, %v2266_v2  ;;  %v4361_v39 = vadd.f32 %v3080_v62, %v4082_v5  ;;  %v4369_v4 = vadd.f32 %v4366_v19, %v1554_v29  ;;  %v2560_v11 = vadd.f32 %v2559_v25, %v2558_v58  ;;  %v2116_v33 = vpop.permute.xlu1 %2115 }
 0x2fa   :  { %v2563_v40 = vadd.f32 %v2562_v42, %v2561_v53  ;;  %v2569_v50 = vrot.slane %v2568_v12, 4  ;;  %3292 = vpow2.f32 %v2041_v20  ;;  %v2544_v51 = vadd.f32 %v2543_v7, %v2542_v16 }
 0x2fb   :  { %v2584_v34 = vadd.f32 %v2583_v56, %v2582_v24  ;;  %v1927_v26 = vsel %vm194_vm0, %v4361_v39, -inf  ;;  %v1913_v5 = vsel %vm194_vm0, %v4369_v4, -inf  ;;  %v2579_v22 = vadd.f32 %v2578_v47, %v2577_v59  ;;  %v3081_v56 = vpop.f32.mrf.mxu0 }
 0x2fc   :  { %v2298_v62 = vrot.slane %v2297_v1, 2  ;;  %v1898_v55 = vmax.f32 %v1896_v15, %v1897_v45  ;;  %v2202_v63 = vmul.f32 %v4210_v23, %v2116_v33  ;;  %v4376_v36 = vpop.eup %3288  ;;  %v2047_v58 = vmul.f32 1.442695, %v1992_v27 }
 0x2fd   :  { %v2204_v53 = vmul.f32 %v4199_v13, %v2120_v14  ;;  %v1928_v16 = vrot.slane %v1927_v26, 4  ;;  %v1914_v24 = vrot.slane %v1913_v5, 4  ;;  %3294 = vrcp.f32 %v2539_v37 }
 0x2fe   :  { %v2564_v25 = vrot.slane %v2563_v40, 2  ;;  %v2570_v42 = vadd.f32 %v2569_v50, %v2568_v12  ;;  %v2712_v20 = vmul.f32 %v4268_v9, %v2280_v6  ;;  %v2545_v21 = vrot.slane %v2544_v51, 1 }
 0x2ff   :  { %v2585_v29 = vrot.slane %v2584_v34, 2  ;;  %v4382_v59 = vsel %vm2745_vm2, %v2710_v18, %v4337_v61  ;;  %v1929_v23 = vmax.f32 %v1927_v26, %v1928_v16  ;;  %3296 = vrcp.f32 %v2560_v11 }
 0x300   :  { %4779 = vst [vmem:[#allocation13_spill] sm:$0xff] %v4382_v59  ;;  %v1990_v15 = vsub.f32 %v4330_v41, %v1898_v55  ;;  %v2288_v7 = vsel %vm194_vm0, %v2202_v63, 0.0  ;;  %v1915_v13 = vmax.f32 %v1913_v5, %v1914_v24  ;;  %v2580_v2 = vrot.slane %v2579_v22, 1 }
 0x301   :  { %v2299_v37 = vadd.f32 %v2298_v62, %v2297_v1  ;;  %3298 = vpow2.f32 %v2047_v58  ;;  %v2302_v12 = vsel %vm194_vm0, %v2204_v53, 0.0  ;;  %v2565_v47 = vadd.f32 %v2564_v25, %v2563_v40  ;;  %v1557_v1 = vpop.f32.mrf.mxu0 }
 0x302   :  { %v4387_v9 = vpop.eup %3290  ;;  %v2571_v6 = vrot.slane %v2570_v42, 2  ;;  %v1930_v45 = vrot.slane %v1929_v23, 2  ;;  %v1916_v61 = vrot.slane %v1915_v13, 2  ;;  %v2546_v18 = vadd.f32 %v2545_v21, %v2544_v51 }
 0x303   :  { %v2586_v27 = vadd.f32 %v2585_v29, %v2584_v34  ;;  %v2289_v11 = vrot.slane %v2288_v7, 4  ;;  %v4390_v41 = vadd.f32 %v4366_v19, %v3081_v56  ;;  %v2043_v50 = vmul.f32 1.442695, %v1990_v15 }
 0x304   :  { %v2303_v33 = vrot.slane %v2302_v12, 4  ;;  %v1931_v26 = vmax.f32 %v1929_v23, %v1930_v45  ;;  %v1917_v5 = vmax.f32 %v1915_v13, %v1916_v61  ;;  %v2581_v62 = vadd.f32 %v2580_v2, %v2579_v22 }
 0x305   :  { %v2603_v55 = vsel %vm194_vm0, %v4387_v9, 0.0  ;;  %v2300_v63 = vrot.slane %v2299_v37, 1  ;;  %v1934_v40 = vsel %vm194_vm0, %v4390_v41, -inf  ;;  %v2566_v14 = vrot.slane %v2565_v47, 1 }
 0x306   :  { %v2572_v51 = vadd.f32 %v2571_v6, %v2570_v42  ;;  %v1918_v34 = vrot.slane %v1917_v5, 1  ;;  %v1935_v58 = vrot.slane %v1934_v40, 4  ;;  %v2587_v16 = vrot.slane %v2586_v27, 1 }
 0x307   :  { %v4396_v53 = vpop.eup %3292  ;;  %v2290_v24 = vadd.f32 %v2289_v11, %v2288_v7  ;;  %v1932_v25 = vrot.slane %v1931_v26, 1  ;;  %v4399_v21 = vadd.f32 %v4366_v19, %v1557_v1  ;;  %v2604_v22 = vrot.slane %v2603_v55, 4 }
 0x308   :  { %3300 = vpow2.f32 %v2043_v50  ;;  %v2304_v29 = vadd.f32 %v2303_v33, %v2302_v12  ;;  %v1936_v23 = vmax.f32 %v1934_v40, %v1935_v58  ;;  %v4403_v15 = vsel %vm2745_vm2, %v2712_v20, %v4321_v38  ;;  %v3084_v50 = vpop.f32.mrf.mxu0 }
 0x309   :  { %3302 = vrcp.f32 %v2546_v18  ;;  %4780 = vst [vmem:[#allocation14_spill] sm:$0xff] %v4403_v15  ;;  %v2301_v42 = vadd.f32 %v2300_v63, %v2299_v37  ;;  %v1920_v13 = vsel %vm194_vm0, %v4399_v21, -inf  ;;  %v2567_v56 = vadd.f32 %v2566_v14, %v2565_v47  ;;  %v2126_v37 = vpop.permute.xlu1 %2125 }
 0x30a   :  { %v2573_v2 = vrot.slane %v2572_v51, 1  ;;  %v2589_v7 = vsel %vm194_vm0, %v4396_v53, 0.0  ;;  %v1919_v6 = vmax.f32 %v1917_v5, %v1918_v34  ;;  %v4409_v45 = vpop.eup %3294  ;;  %v2588_v61 = vadd.f32 %v2587_v16, %v2586_v27 }
 0x30b   :  { %v2291_v12 = vrot.slane %v2290_v24, 2  ;;  %v1933_v11 = vmax.f32 %v1931_v26, %v1932_v25  ;;  %v1937_v18 = vrot.slane %v1936_v23, 2  ;;  %3304 = vrcp.f32 %v2581_v62 }
 0x30c   :  { %v2605_v38 = vadd.f32 %v2604_v22, %v2603_v55  ;;  %v2305_v20 = vrot.slane %v2304_v29, 2  ;;  %v1921_v33 = vrot.slane %v1920_v13, 4  ;;  %v4411_v1 = vpop.eup %3296  ;;  %v2590_v47 = vrot.slane %v2589_v7, 4  ;;  %v2128_v22 = vpop.permute.xlu0 %2127 }
 0x30d   :  { %4781 = vst [vmem:[#allocation15_spill] sm:$0xff] %v4411_v1  ;;  %v4414_v63 = vmul.f32 %v4298_v17, %v2301_v42  ;;  %v2207_v5 = vmul.f32 %v4244_v48, %v2126_v37  ;;  %v1938_v40 = vmax.f32 %v1936_v23, %v1937_v18  ;;  %3306 = vrcp.f32 %v2567_v56  ;;  %v1570_v23 = vpop.f32.mrf.mxu0 }
 0x30e   :  { %v4417_v14 = vpop.eup %3298  ;;  %v1993_v27 = vsub.f32 %v4369_v4, %v1919_v6  ;;  %v1922_v26 = vmax.f32 %v1920_v13, %v1921_v33  ;;  %v4421_v62 = vadd.f32 %v4366_v19, %v3084_v50  ;;  %3308 = vrcp.f32 %v2588_v61 }
 0x30f   :  { %4782 = vst [vmem:[#allocation16_spill] sm:$0xff] %v4414_v63  ;;  %v2574_v55 = vadd.f32 %v2573_v2, %v2572_v51  ;;  %v4423_v34 = vadd.f32 %v2291_v12, %v2290_v24  ;;  %v1995_v58 = vsub.f32 %v4361_v39, %v1933_v11  ;;  %v2606_v17 = vrot.slane %v2605_v38, 2 }
 0x310   :  { %v4426_v16 = vadd.f32 %v2305_v20, %v2304_v29  ;;  %v1939_v48 = vrot.slane %v1938_v40, 1  ;;  %v1923_v25 = vrot.slane %v1922_v26, 2  ;;  %v2591_v42 = vadd.f32 %v2590_v47, %v2589_v7  ;;  %v2134_v47 = vpop.permute.xlu1 %2133 }
 0x311   :  { %v2610_v4 = vsel %vm194_vm0, %v4417_v14, 0.0  ;;  %v2323_v13 = vsel %vm194_vm0, %v2207_v5, 0.0  ;;  %v1955_v51 = vsel %vm194_vm0, %v4421_v62, -inf  ;;  %v2049_v24 = vmul.f32 1.442695, %v1993_v27 }
 0x312   :  { %v1940_v56 = vmax.f32 %v1938_v40, %v1939_v48  ;;  %v1924_v2 = vmax.f32 %v1922_v26, %v1923_v25  ;;  %v1956_v39 = vrot.slane %v1955_v51, 4  ;;  %3310 = vrcp.f32 %v2574_v55  ;;  %v2124_v55 = vpop.permute.xlu0 %2123  ;;  %v3085_v25 = vpop.f32.mrf.mxu0 }
 0x313   :  { %v2053_v29 = vmul.f32 1.442695, %v1995_v58  ;;  %v2208_v6 = vmul.f32 %v4292_v3, %v2128_v22  ;;  %v4435_v61 = vadd.f32 %v4366_v19, %v1570_v23  ;;  %v2324_v7 = vrot.slane %v2323_v13, 4 }
 0x314   :  { %v1996_v12 = vsub.f32 %v4390_v41, %v1940_v56  ;;  %v1925_v11 = vrot.slane %v1924_v2, 1  ;;  %v1957_v18 = vmax.f32 %v1955_v51, %v1956_v39  ;;  %v2592_v20 = vrot.slane %v2591_v42, 2 }
 0x315   :  { %v4438_v50 = vpop.eup %3300  ;;  %v2611_v37 = vrot.slane %v2610_v4, 4  ;;  %v2293_v33 = vrot.slane %v4423_v34, 1  ;;  %v1941_v5 = vsel %vm194_vm0, %v4435_v61, -inf  ;;  %v2607_v3 = vadd.f32 %v2606_v17, %v2605_v38 }
 0x316   :  { %v4443_v40 = vpop.eup %3302  ;;  %3312 = vpow2.f32 %v2049_v24  ;;  %v1926_v27 = vmax.f32 %v1924_v2, %v1925_v11  ;;  %v1958_v26 = vrot.slane %v1957_v18, 2  ;;  %v2055_v41 = vmul.f32 1.442695, %v1996_v12  ;;  %v4455_v15 = vpop.permute.xlu0 %2131 }
 0x317   :  { %3314 = vpow2.f32 %v2053_v29  ;;  %v2330_v58 = vsel %vm194_vm0, %v2208_v6, 0.0  ;;  %v1942_v48 = vrot.slane %v1941_v5, 4  ;;  %v2596_v22 = vsel %vm194_vm0, %v4438_v50, 0.0 }
 0x318   :  { %v2325_v23 = vadd.f32 %v2324_v7, %v2323_v13  ;;  %v1994_v51 = vsub.f32 %v4399_v21, %v1926_v27  ;;  %v1959_v56 = vmax.f32 %v1957_v18, %v1958_v26  ;;  %v4449_v39 = vpop.eup %3304  ;;  %v2593_v38 = vadd.f32 %v2592_v20, %v2591_v42  ;;  %v4459_v18 = vpop.permute.xlu1 %2135 }
 0x319   :  { %v2612_v17 = vadd.f32 %v2611_v37, %v2610_v4  ;;  %v2211_v24 = vmul.f32 %v4318_v31, %v2134_v47  ;;  %v1943_v2 = vmax.f32 %v1941_v5, %v1942_v48  ;;  %v2331_v12 = vrot.slane %v2330_v58, 4 }
 0x31a   :  { %v2051_v29 = vmul.f32 1.442695, %v1994_v51  ;;  %v1960_v11 = vrot.slane %v1959_v56, 1  ;;  %v4453_v6 = vadd.f32 %v4366_v19, %v3085_v25  ;;  %v4457_v59 = vpop.eup %3306  ;;  %v2608_v13 = vrot.slane %v2607_v3, 1 }
 0x31b   :  { %v2597_v21 = vrot.slane %v2596_v22, 4  ;;  %3316 = vpow2.f32 %v2055_v41  ;;  %v1944_v7 = vrot.slane %v1943_v2, 2  ;;  %v4461_v42 = vpop.eup %3308  ;;  %v2307_v31 = vrot.slane %v4426_v16, 1 }
 0x31c   :  { %4783 = vst [vmem:[#allocation17_spill] sm:$0xff] %v4461_v42  ;;  %v2326_v4 = vrot.slane %v2325_v23, 2  ;;  %v1961_v20 = vmax.f32 %v1959_v56, %v1960_v11  ;;  %v1962_v37 = vsel %vm194_vm0, %v4453_v6, -inf  ;;  %v2594_v47 = vrot.slane %v2593_v38, 1  ;;  %v4469_v30 = vpop.permute.xlu1 %2149 }
 0x31d   :  { %3318 = vpow2.f32 %v2051_v29  ;;  %v2351_v5 = vsel %vm194_vm0, %v2211_v24, 0.0  ;;  %v1945_v27 = vmax.f32 %v1943_v2, %v1944_v7  ;;  %v2613_v26 = vrot.slane %v2612_v17, 2  ;;  %v2142_v2 = vpop.permute.xlu0 %2141 }
 0x31e   :  { %v2294_v41 = vadd.f32 %v2293_v33, %v4423_v34  ;;  %v2332_v48 = vadd.f32 %v2331_v12, %v2330_v58  ;;  %v1999_v25 = vsub.f32 %v4421_v62, %v1961_v20  ;;  %v2609_v51 = vadd.f32 %v2608_v13, %v2607_v3  ;;  %v1573_v62 = vpop.f32.mrf.mxu0 }
 0x31f   :  { %v2598_v42 = vadd.f32 %v2597_v21, %v2596_v22  ;;  %v1946_v1 = vrot.slane %v1945_v27, 1  ;;  %v1963_v63 = vrot.slane %v1962_v37, 4  ;;  %v4471_v56 = vpop.eup %3310  ;;  %v2308_v11 = vadd.f32 %v2307_v31, %v4426_v16 }
 0x320   :  { %v2061_v29 = vmul.f32 1.442695, %v1999_v25  ;;  %v2352_v35 = vrot.slane %v2351_v5, 4  ;;  %v2206_v24 = vmul.f32 %v4313_v46, %v2124_v55  ;;  %v2595_v7 = vadd.f32 %v2594_v47, %v2593_v38  ;;  %v4488_v31 = vpop.permute.xlu1 %2151 }
 0x321   :  { %v2327_v34 = vadd.f32 %v2326_v4, %v2325_v23  ;;  %v1947_v33 = vmax.f32 %v1945_v27, %v1946_v1  ;;  %v1964_v58 = vmax.f32 %v1962_v37, %v1963_v63  ;;  %v2614_v3 = vadd.f32 %v2613_v26, %v2612_v17 }
 0x322   :  { %v4476_v22 = vmul.f32 %v4351_v32, %v2294_v41  ;;  %v4479_v12 = vmul.f32 %v4308_v8, %v2308_v11  ;;  %v2333_v13 = vrot.slane %v2332_v48, 2  ;;  %3320 = vrcp.f32 %v2609_v51 }
 0x323   :  { %v4481_v21 = vpop.eup %3312  ;;  %v2599_v16 = vrot.slane %v2598_v42, 2  ;;  %v1997_v46 = vsub.f32 %v4435_v61, %v1947_v33  ;;  %v1965_v55 = vrot.slane %v1964_v58, 2  ;;  %3322 = vpow2.f32 %v2061_v29 }
 0x324   :  { %4784 = vst [vmem:[#allocation18_spill] sm:$0xff] %v4476_v22  ;;  %4785 = vst [vmem:[#allocation19_spill] sm:$0xff] %v4479_v12  ;;  %v3315_v38 = vpop.eup %3314  ;;  %v2353_v1 = vadd.f32 %v2352_v35, %v2351_v5  ;;  %v2316_v63 = vsel %vm194_vm0, %v2206_v24, 0.0  ;;  %v4486_v23 = vadd.f32 %v4366_v19, %v1573_v62  ;;  %3324 = vrcp.f32 %v2595_v7  ;;  %v4494_v35 = vpop.permute.xlu0 %2143 }
 0x325   :  { %v2328_v32 = vrot.slane %v2327_v34, 1  ;;  %v2057_v8 = vmul.f32 1.442695, %v1997_v46  ;;  %v1966_v17 = vmax.f32 %v1964_v58, %v1965_v55  ;;  %v2615_v4 = vrot.slane %v2614_v3, 1  ;;  %v4509_v46 = vpop.permute.xlu1 %2147 }
 0x326   :  { %v2617_v20 = vsel %vm194_vm0, %v4481_v21, 0.0  ;;  %v2334_v61 = vadd.f32 %v2333_v13, %v2332_v48  ;;  %v1948_v37 = vsel %vm194_vm0, %v4486_v23, -inf  ;;  %v2631_v47 = vsel %vm194_vm0, %v3315_v38, 0.0 }
 0x327   :  { %v2317_v19 = vrot.slane %v2316_v63, 4  ;;  %v1967_v5 = vrot.slane %v1966_v17, 1  ;;  %v2210_v27 = vmul.f32 %v4347_v60, %v4455_v15  ;;  %v2600_v41 = vadd.f32 %v2599_v16, %v2598_v42 }
 0x328   :  { %v4499_v26 = vpop.eup %3316  ;;  %v2354_v25 = vrot.slane %v2353_v1, 2  ;;  %3326 = vpow2.f32 %v2057_v8  ;;  %v1949_v51 = vrot.slane %v1948_v37, 4  ;;  %v2618_v11 = vrot.slane %v2617_v20, 4 }
 0x329   :  { %v2329_v48 = vadd.f32 %v2328_v32, %v2327_v34  ;;  %v1968_v29 = vmax.f32 %v1966_v17, %v1967_v5  ;;  %v2212_v24 = vmul.f32 %v4341_v44, %v4459_v18  ;;  %v2616_v33 = vadd.f32 %v2615_v4, %v2614_v3  ;;  %v4513_v3 = vpop.permute.xlu0 %2139 }
 0x32a   :  { %v4503_v7 = vpop.eup %3318  ;;  %v2632_v58 = vrot.slane %v2631_v47, 4  ;;  %v2335_v62 = vrot.slane %v2334_v61, 1  ;;  %v1950_v13 = vmax.f32 %v1948_v37, %v1949_v51  ;;  %v2638_v60 = vsel %vm194_vm0, %v4499_v26, 0.0 }
 0x32b   :  { %v2318_v15 = vadd.f32 %v2317_v19, %v2316_v63  ;;  %v2000_v42 = vsub.f32 %v4453_v6, %v1968_v29  ;;  %v2344_v16 = vsel %vm194_vm0, %v2210_v27, 0.0  ;;  %v2601_v34 = vrot.slane %v2600_v41, 1 }
 0x32c   :  { %v2624_v44 = vsel %vm194_vm0, %v4503_v7, 0.0  ;;  %v2355_v18 = vadd.f32 %v2354_v25, %v2353_v1  ;;  %v1951_v55 = vrot.slane %v1950_v13, 2  ;;  %v2619_v32 = vadd.f32 %v2618_v11, %v2617_v20 }
 0x32d   :  { %v2063_v8 = vmul.f32 1.442695, %v2000_v42  ;;  %v2358_v17 = vsel %vm194_vm0, %v2212_v24, 0.0  ;;  %v2215_v63 = vmul.f32 %v4387_v9, %v2142_v2  ;;  %v2639_v4 = vrot.slane %v2638_v60, 4  ;;  %v4523_v11 = vpop.permute.xlu0 %2155 }
 0x32e   :  { %v1952_v6 = vmax.f32 %v1950_v13, %v1951_v55  ;;  %v2345_v37 = vrot.slane %v2344_v16, 4  ;;  %v2219_v19 = vmul.f32 %v3315_v38, %v4469_v30  ;;  %v2633_v5 = vadd.f32 %v2632_v58, %v2631_v47  ;;  %v4528_v38 = vpop.permute.xlu1 %2159 }
 0x32f   :  { %v2625_v27 = vrot.slane %v2624_v44, 4  ;;  %v2319_v51 = vrot.slane %v2318_v15, 2  ;;  %3328 = vpow2.f32 %v2063_v8  ;;  %v4518_v29 = vpop.eup %3320  ;;  %v2602_v1 = vadd.f32 %v2601_v34, %v2600_v41 }
 0x330   :  { %3330 = vrcp.f32 %v2616_v33  ;;  %v4521_v20 = vmul.f32 %v4376_v36, %v2329_v48  ;;  %v1953_v25 = vrot.slane %v1952_v6, 1  ;;  %v4525_v9 = vpop.eup %3322  ;;  %v2620_v2 = vrot.slane %v2619_v32, 2 }
 0x331   :  { %v2356_v24 = vrot.slane %v2355_v18, 1  ;;  %v2359_v13 = vrot.slane %v2358_v17, 4  ;;  %v2379_v30 = vsel %vm194_vm0, %v2215_v63, 0.0  ;;  %v4530_v47 = vpop.eup %3324  ;;  %v2640_v58 = vadd.f32 %v2639_v4, %v2638_v60 }
 0x332   :  { %4786 = vst [vmem:[#allocation20_spill] sm:$0xff] %v4521_v20  ;;  %v1954_v33 = vmax.f32 %v1952_v6, %v1953_v25  ;;  %v2346_v41 = vadd.f32 %v2345_v37, %v2344_v16  ;;  %v2407_v36 = vsel %vm194_vm0, %v2219_v19, 0.0  ;;  %v2634_v48 = vrot.slane %v2633_v5, 2 }
 0x333   :  { %v2626_v42 = vadd.f32 %v2625_v27, %v2624_v44  ;;  %v4533_v34 = vadd.f32 %v2335_v62, %v2334_v61  ;;  %v2320_v55 = vadd.f32 %v2319_v51, %v2318_v15  ;;  %3332 = vrcp.f32 %v2602_v1  ;;  %v4542_v62 = vpop.permute.xlu0 %2157  ;;  %v2106_v51 = vpop.permute.xlu1 %2105 }
 0x334   :  { %v2659_v8 = vsel %vm194_vm0, %v4525_v9, 0.0  ;;  %v1998_v63 = vsub.f32 %v4486_v23, %v1954_v33  ;;  %v2380_v12 = vrot.slane %v2379_v30, 4  ;;  %v2621_v20 = vadd.f32 %v2620_v2, %v2619_v32 }
 0x335   :  { %v4538_v22 = vpop.eup %3326  ;;  %v2357_v60 = vadd.f32 %v2356_v24, %v2355_v18  ;;  %v2360_v4 = vadd.f32 %v2359_v13, %v2358_v17  ;;  %v2408_v16 = vrot.slane %v2407_v36, 4  ;;  %v2641_v6 = vrot.slane %v2640_v58, 2 }
 0x336   :  { %v2059_v37 = vmul.f32 1.442695, %v1998_v63  ;;  %v2347_v19 = vrot.slane %v2346_v41, 2  ;;  %v2216_v61 = vmul.f32 %v4417_v14, %v4494_v35  ;;  %v4544_v15 = vadd.f32 %v2634_v48, %v2633_v5 }
 0x337   :  { %v2627_v44 = vrot.slane %v2626_v42, 2  ;;  %v2660_v27 = vrot.slane %v2659_v8, 4  ;;  %v2321_v23 = vrot.slane %v2320_v55, 1  ;;  %v2645_v32 = vsel %vm194_vm0, %v4538_v22, 0.0 }
 0x338   :  { %3334 = vpow2.f32 %v2059_v37  ;;  %v2381_v18 = vadd.f32 %v2380_v12, %v2379_v30  ;;  %v2220_v17 = vmul.f32 %v4499_v26, %v4488_v31  ;;  %v2622_v1 = vrot.slane %v2621_v20, 1 }
 0x339   :  { %v4551_v25 = vmul.f32 %v4449_v39, %v2357_v60  ;;  %v2361_v14 = vrot.slane %v2360_v4, 2  ;;  %v2409_v35 = vadd.f32 %v2408_v16, %v2407_v36  ;;  %v2642_v5 = vadd.f32 %v2641_v6, %v2640_v58  ;;  %v2098_v36 = vpop.permute.xlu0 %2097 }
 0x33a   :  { %v2348_v2 = vadd.f32 %v2347_v19, %v2346_v41  ;;  %v2386_v24 = vsel %vm194_vm0, %v2216_v61, 0.0  ;;  %v2197_v13 = vmul.f32 %v4170_v0, %v2106_v51  ;;  %v2628_v48 = vadd.f32 %v2627_v44, %v2626_v42 }
 0x33b   :  { %v2646_v63 = vrot.slane %v2645_v32, 4  ;;  %v2322_v12 = vadd.f32 %v2321_v23, %v2320_v55  ;;  %v2661_v37 = vadd.f32 %v2660_v27, %v2659_v8  ;;  %v2382_v31 = vrot.slane %v2381_v18, 2 }
 0x33c   :  { %v3329_v30 = vpop.eup %3328  ;;  %v2414_v26 = vsel %vm194_vm0, %v2220_v17, 0.0  ;;  %v2214_v39 = vmul.f32 %v4438_v50, %v4513_v3  ;;  %v2623_v41 = vadd.f32 %v2622_v1, %v2621_v20  ;;  %v2410_v60 = vrot.slane %v2409_v35, 2 }
 0x33d   :  { %v4559_v58 = vpop.eup %3330  ;;  %v2387_v16 = vrot.slane %v2386_v24, 4  ;;  %v2253_v0 = vsel %vm194_vm0, %v2197_v13, 0.0  ;;  %v2643_v6 = vrot.slane %v2642_v5, 1  ;;  %v4562_v42 = vadd.f32 %v2361_v14, %v2360_v4  ;;  %v2122_v13 = vpop.permute.xlu1 %2121 }
 0x33e   :  { %4787 = vst [vmem:[#allocation21_spill] sm:$0xff] %v4559_v58  ;;  %v2349_v55 = vrot.slane %v2348_v2, 1  ;;  %v2218_v8 = vmul.f32 %v4503_v7, %v4509_v46  ;;  %v2629_v19 = vrot.slane %v2628_v48, 1  ;;  %v2647_v61 = vadd.f32 %v2646_v63, %v2645_v32 }
 0x33f   :  { %v2666_v44 = vsel %vm194_vm0, %v3329_v30, 0.0  ;;  %v2415_v50 = vrot.slane %v2414_v26, 4  ;;  %v2662_v3 = vrot.slane %v2661_v37, 2  ;;  %v2383_v27 = vadd.f32 %v2382_v31, %v2381_v18  ;;  %v2114_v18 = vpop.permute.xlu0 %2113 }
 0x340   :  { %v2372_v20 = vsel %vm194_vm0, %v2214_v39, 0.0  ;;  %v2254_v23 = vrot.slane %v2253_v0, 4  ;;  %v4568_v51 = vpop.eup %3332  ;;  %3336 = vrcp.f32 %v2623_v41  ;;  %v4571_v4 = vmul.f32 %v4443_v40, %v2322_v12 }
 0x341   :  { %v2411_v17 = vadd.f32 %v2410_v60, %v2409_v35  ;;  %v2388_v1 = vadd.f32 %v2387_v16, %v2386_v24  ;;  %v4573_v14 = vadd.f32 %v2643_v6, %v2642_v5  ;;  %v2667_v7 = vrot.slane %v2666_v44, 4 }
 0x342   :  { %v2400_v32 = vsel %vm194_vm0, %v2218_v8, 0.0  ;;  %v2648_v63 = vrot.slane %v2647_v61, 2  ;;  %v2350_v31 = vadd.f32 %v2349_v55, %v2348_v2  ;;  %v2416_v39 = vadd.f32 %v2415_v50, %v2414_v26  ;;  %v2138_v50 = vpop.permute.xlu1 %2137 }
 0x343   :  { %v2373_v33 = vrot.slane %v2372_v20, 4  ;;  %v4577_v58 = vadd.f32 %v2629_v19, %v2628_v48  ;;  %v4579_v41 = vadd.f32 %v2662_v3, %v2661_v37  ;;  %v2384_v40 = vrot.slane %v2383_v27, 1 }
 0x344   :  { %v2255_v35 = vadd.f32 %v2254_v23, %v2253_v0  ;;  %v2412_v5 = vrot.slane %v2411_v17, 1  ;;  %v2389_v12 = vrot.slane %v2388_v1, 2  ;;  %v2401_v60 = vrot.slane %v2400_v32, 4 }
 0x345   :  { %v3335_v24 = vpop.eup %3334  ;;  %v2205_v16 = vmul.f32 %v4282_v28, %v2122_v13  ;;  %v2668_v6 = vadd.f32 %v2667_v7, %v2666_v44  ;;  %v2224_v46 = vmul.f32 %v3329_v30, %v4528_v38  ;;  %v2193_v2 = vmul.f32 %v4146_v57, %v2098_v36  ;;  %v2130_v38 = vpop.permute.xlu0 %2129 }
 0x346   :  { %v2652_v8 = vsel %vm194_vm0, %v3335_v24, 0.0  ;;  %v4585_v26 = vadd.f32 %v2648_v63, %v2647_v61  ;;  %v4588_v48 = vmul.f32 %v4471_v56, %v2350_v31  ;;  %v2417_v37 = vrot.slane %v2416_v39, 2 }
 0x347   :  { %v4590_v0 = vadd.f32 %v2373_v33, %v2372_v20  ;;  %v4592_v55 = vadd.f32 %v2384_v40, %v2383_v27  ;;  %v2256_v19 = vrot.slane %v2255_v35, 2  ;;  %v2223_v28 = vmul.f32 %v4525_v9, %v4542_v62 }
 0x348   :  { %v2309_v44 = vsel %vm194_vm0, %v2205_v16, 0.0  ;;  %v2653_v30 = vrot.slane %v2652_v8, 4  ;;  %v4597_v57 = vadd.f32 %v2412_v5, %v2411_v17  ;;  %v4599_v36 = vadd.f32 %v2389_v12, %v2388_v1 }
 0x349   :  { %v4601_v56 = vadd.f32 %v2401_v60, %v2400_v32  ;;  %v2669_v61 = vrot.slane %v2668_v6, 2  ;;  %v4604_v33 = vsel %vm194_vm0, %v2224_v46, 0.0  ;;  %v2310_v3 = vrot.slane %v2309_v44, 4 }
 0x34a   :  { %v2225_v27 = vsel %vm194_vm0, %v2193_v2, 0.0  ;;  %v2650_v9 = vrot.slane %v4585_v26, 1  ;;  %v4608_v62 = vadd.f32 %v2417_v37, %v2416_v39  ;;  %v2375_v20 = vrot.slane %v4590_v0, 2 }
 0x34b   :  { %v2222_v23 = vmul.f32 %v3335_v24, %v4523_v11  ;;  %v2257_v17 = vadd.f32 %v2256_v19, %v2255_v35  ;;  %v2435_v1 = vsel %vm194_vm0, %v2223_v28, 0.0  ;;  %v2226_v7 = vrot.slane %v2225_v27, 4  ;;  %v2154_v35 = vpop.permute.xlu1 %2153  ;;  %v2146_v24 = vpop.permute.xlu0 %2145 }
 0x34c   :  { %v2201_v32 = vmul.f32 %v4192_v49, %v2114_v18  ;;  %v2654_v13 = vadd.f32 %v2653_v30, %v2652_v8  ;;  %v2213_v31 = vmul.f32 %v4396_v53, %v2138_v50  ;;  %v4619_v39 = vadd.f32 %v2669_v61, %v2668_v6 }
 0x34d   :  { %v4617_v40 = vpop.eup %3336  ;;  %v2311_v5 = vadd.f32 %v2310_v3, %v2309_v44  ;;  %v2227_v12 = vadd.f32 %v2226_v7, %v2225_v27  ;;  %v2428_v60 = vsel %vm194_vm0, %v2222_v23, 0.0  ;;  %v2436_v49 = vrot.slane %v2435_v1, 4 }
 0x34e   :  { %v2281_v11 = vsel %vm194_vm0, %v2201_v32, 0.0  ;;  %v2365_v16 = vsel %vm194_vm0, %v2213_v31, 0.0  ;;  %v2258_v8 = vrot.slane %v2257_v17, 1  ;;  %v2209_v53 = vmul.f32 %v4339_v54, %v2130_v38 }
 0x34f   :  { %v2282_v18 = vrot.slane %v2281_v11, 4  ;;  %v2228_v2 = vrot.slane %v2227_v12, 2  ;;  %v2366_v37 = vrot.slane %v2365_v16, 4  ;;  %v2655_v19 = vrot.slane %v2654_v13, 2 }
 0x350   :  { %v2221_v28 = vmul.f32 %v4538_v22, %v2154_v35  ;;  %v2217_v44 = vmul.f32 %v4481_v21, %v2146_v24  ;;  %v2312_v50 = vrot.slane %v2311_v5, 2  ;;  %v2337_v3 = vsel %vm194_vm0, %v2209_v53, 0.0 }
 0x351   :  { %v2283_v6 = vadd.f32 %v2282_v18, %v2281_v11  ;;  %v2229_v30 = vadd.f32 %v2228_v2, %v2227_v12  ;;  %v2367_v61 = vadd.f32 %v2366_v37, %v2365_v16  ;;  %v2671_v27 = vrot.slane %v4619_v39, 1 }
 0x352   :  { %v2437_v23 = vadd.f32 %v2436_v49, %v2435_v1  ;;  %v2338_v32 = vrot.slane %v2337_v3, 4  ;;  %v2429_v31 = vrot.slane %v2428_v60, 4  ;;  %v2259_v63 = vadd.f32 %v2258_v8, %v2257_v17 }
 0x353   :  { %v2284_v7 = vrot.slane %v2283_v6, 2  ;;  %v2230_v46 = vrot.slane %v2229_v30, 1  ;;  %v2368_v54 = vrot.slane %v2367_v61, 2  ;;  %v2421_v22 = vsel %vm194_vm0, %v2221_v28, 0.0 }
 0x354   :  { %v2339_v11 = vadd.f32 %v2338_v32, %v2337_v3  ;;  %v2393_v21 = vsel %vm194_vm0, %v2217_v44, 0.0  ;;  %v2656_v35 = vadd.f32 %v2655_v19, %v2654_v13  ;;  %v2313_v12 = vadd.f32 %v2312_v50, %v2311_v5 }
 0x355   :  { %v2285_v38 = vadd.f32 %v2284_v7, %v2283_v6  ;;  %v2231_v24 = vadd.f32 %v2230_v46, %v2229_v30  ;;  %v2369_v18 = vadd.f32 %v2368_v54, %v2367_v61  ;;  %v2394_v37 = vrot.slane %v2393_v21, 4 }
 0x356   :  { %v2340_v2 = vrot.slane %v2339_v11, 2  ;;  %v4788_v1 = vrot.slane %v4544_v15, 1  ;;  %v2709_v17 = vmul.f32 %v4260_v43, %v2259_v63  ;;  %v2422_v53 = vrot.slane %v2421_v22, 4 }
 0x357   :  { %v2286_v16 = vrot.slane %v2285_v38, 1  ;;  %v2705_v8 = vmul.f32 %v4227_v10, %v2231_v24  ;;  %v2664_v6 = vrot.slane %v4579_v41, 1  ;;  %v2395_v13 = vadd.f32 %v2394_v37, %v2393_v21 }
 0x358   :  { %v2637_v49 = vadd.f32 %v4788_v1, %v4544_v15  ;;  %v2341_v44 = vadd.f32 %v2340_v2, %v2339_v11  ;;  %v2314_v46 = vrot.slane %v2313_v12, 1  ;;  %v2370_v19 = vrot.slane %v2369_v18, 1  ;;  %v4792_v1 = vld [vmem:[#allocation12_spill] sm:$0xff] }
 0x359   :  { %v2287_v28 = vadd.f32 %v2286_v16, %v2285_v38  ;;  %v2746_v5 = vsel %vm2745_vm2, %v2709_v17, %v2705_v8  ;;  %v2665_v50 = vadd.f32 %v2664_v6, %v4579_v41  ;;  %v2657_v30 = vrot.slane %v2656_v35, 1 }
 0x35a   :  { %3338 = vrcp.f32 %v2637_v49  ;;  %v2342_v61 = vrot.slane %v2341_v44, 1  ;;  %v2396_v43 = vrot.slane %v2395_v13, 2  ;;  %v2430_v63 = vadd.f32 %v2429_v31, %v2428_v60 }
 0x35b   :  { %v2713_v15 = vmul.f32 %v4302_v52, %v2287_v28  ;;  %v2438_v10 = vrot.slane %v2437_v23, 2  ;;  %3340 = vrcp.f32 %v2665_v50  ;;  %v2423_v32 = vadd.f32 %v2422_v53, %v2421_v22  ;;  %v4793_v53 = vld [vmem:[#allocation16_spill] sm:$0xff] }
 0x35c   :  { %v2343_v7 = vadd.f32 %v2342_v61, %v2341_v44  ;;  %v2397_v54 = vadd.f32 %v2396_v43, %v2395_v13  ;;  %v2651_v38 = vadd.f32 %v2650_v9, %v4585_v26  ;;  %v2376_v41 = vadd.f32 %v2375_v20, %v4590_v0 }
 0x35d   :  { %v2748_v3 = vsel %vm2747_vm3, %v2713_v15, %v2746_v5  ;;  %v2315_v52 = vadd.f32 %v2314_v46, %v2313_v12  ;;  %v2371_v11 = vadd.f32 %v2370_v19, %v2369_v18  ;;  %v4789_v60 = vrot.slane %v4601_v56, 2 }
 0x35e   :  { %v4790_v21 = vrot.slane %v4604_v33, 4  ;;  %v2398_v22 = vrot.slane %v2397_v54, 1  ;;  %v2658_v16 = vadd.f32 %v2657_v30, %v2656_v35  ;;  %v2431_v2 = vrot.slane %v2430_v63, 2 }
 0x35f   :  { %v2404_v31 = vadd.f32 %v4789_v60, %v4601_v56  ;;  %v2439_v37 = vadd.f32 %v2438_v10, %v2437_v23  ;;  %3342 = vrcp.f32 %v4577_v58  ;;  %v2672_v26 = vadd.f32 %v2671_v27, %v4619_v39 }
 0x360   :  { %v2444_v24 = vadd.f32 %v4790_v21, %v4604_v33  ;;  %v2721_v0 = vmul.f32 %v4457_v59, %v2343_v7  ;;  %v2424_v9 = vrot.slane %v2423_v32, 2  ;;  %v2399_v20 = vadd.f32 %v2398_v22, %v2397_v54  ;;  %v4796_v54 = vld [vmem:[#allocation15_spill] sm:$0xff] }
 0x361   :  { %3344 = vrcp.f32 %v2658_v16  ;;  %v2377_v12 = vrot.slane %v2376_v41, 1  ;;  %v2717_v56 = vmul.f32 %v4409_v45, %v2315_v52  ;;  %v2725_v18 = vmul.f32 %v4530_v47, %v2371_v11  ;;  %v4797_v52 = vld [vmem:[#allocation13_spill] sm:$0xff]  ;;  %v4798_v11 = vld [vmem:[#allocation18_spill] sm:$0xff] }
 0x362   :  { %3346 = vrcp.f32 %v4573_v14  ;;  %v2445_v33 = vrot.slane %v2444_v24, 2  ;;  %v2729_v35 = vmul.f32 %v4617_v40, %v2399_v20  ;;  %v2440_v58 = vrot.slane %v2439_v37, 1  ;;  %v4791_v14 = vld [vmem:[#allocation11_spill] sm:$0xff] }
 0x363   :  { %3348 = vrcp.f32 %v2672_v26  ;;  %v2750_v59 = vsel %vm2749_vm4, %v2717_v56, %v2748_v3  ;;  %v2432_v39 = vadd.f32 %v2431_v2, %v2430_v63  ;;  %v2425_v27 = vadd.f32 %v2424_v9, %v2423_v32  ;;  %v4800_v9 = vld [vmem:[#allocation21_spill] sm:$0xff] }
 0x364   :  { %3350 = vrcp.f32 %v2651_v38  ;;  %v2752_v23 = vsel %vm2751_vm5, %v2721_v0, %v2750_v59  ;;  %v2727_v47 = vmul.f32 %v4518_v29, %v4592_v55  ;;  %v2786_v40 = vsel %vm2745_vm2, %v4792_v1, %v4791_v14  ;;  %v4794_v29 = vld [vmem:[#allocation20_spill] sm:$0xff] }
 0x365   :  { %v2754_v49 = vsel %vm2753_vm6, %v2725_v18, %v2752_v23  ;;  %v2446_v17 = vadd.f32 %v2445_v33, %v2444_v24  ;;  %v2787_v6 = vsel %vm2747_vm3, %v4793_v53, %v2786_v40  ;;  %v2391_v44 = vrot.slane %v4599_v36, 1  ;;  %v4799_v24 = vld [vmem:[#allocation17_spill] sm:$0xff] }
 0x366   :  { %v2756_v28 = vsel %vm2755_vm7, %v2729_v35, %v2754_v49  ;;  %v2405_v13 = vrot.slane %v2404_v31, 1  ;;  %v2441_v46 = vadd.f32 %v2440_v58, %v2439_v37  ;;  %v2788_v55 = vsel %vm2749_vm4, %v4794_v29, %v2787_v6  ;;  %v4802_v58 = vld [vmem:[#allocation19_spill] sm:$0xff] }
 0x367   :  { %v3339_v45 = vpop.eup %3338  ;;  %v2378_v19 = vadd.f32 %v2377_v12, %v2376_v41  ;;  %v2433_v50 = vrot.slane %v2432_v39, 1  ;;  %v2789_v30 = vsel %vm2751_vm5, %v4551_v25, %v2788_v55  ;;  %v2426_v15 = vrot.slane %v2425_v27, 1 }
 0x368   :  { %v2731_v8 = vmul.f32 %v3339_v45, %v4597_v57  ;;  %v3341_v5 = vpop.eup %3340  ;;  %v2419_v57 = vrot.slane %v4608_v62, 1  ;;  %v2790_v43 = vsel %vm2753_vm6, %v2727_v47, %v2789_v30  ;;  %v4795_v63 = vrot.slane %v4562_v42, 1 }
 0x369   :  { %v2735_v61 = vmul.f32 %v3341_v5, %v2441_v46  ;;  %v2726_v3 = vmul.f32 %v4568_v51, %v2378_v19  ;;  %v2447_v7 = vrot.slane %v2446_v17, 1  ;;  %v2720_v38 = vmul.f32 %v4796_v54, %v4533_v34 }
 0x36a   :  { %v2364_v10 = vadd.f32 %v4795_v63, %v4562_v42  ;;  %v2791_v32 = vsel %vm2755_vm7, %v2731_v8, %v2790_v43  ;;  %v2406_v41 = vadd.f32 %v2405_v13, %v2404_v31  ;;  %v2769_v60 = vsel %vm2747_vm3, %v4798_v11, %v4797_v52 }
 0x36b   :  { %v2792_v25 = vsel %vm2757_vm8, %v2735_v61, %v2791_v32  ;;  %v2392_v42 = vadd.f32 %v2391_v44, %v4599_v36  ;;  %v2434_v16 = vadd.f32 %v2433_v50, %v2432_v39  ;;  %v2770_v51 = vsel %vm2749_vm4, %v4571_v4, %v2769_v60  ;;  %v4801_v4 = vld [vmem:[#allocation14_spill] sm:$0xff] }
 0x36c   :  { %v3343_v21 = vpop.eup %3342  ;;  %v2724_v22 = vmul.f32 %v4799_v24, %v2364_v10  ;;  %2793 = vrot.lane.b32.xlu1 %v2792_v25, %s3420_s30  ;;  %v2420_v34 = vadd.f32 %v2419_v57, %v4608_v62  ;;  %v2427_v31 = vadd.f32 %v2426_v15, %v2425_v27  ;;  %v2771_v26 = vsel %vm2751_vm5, %v4588_v48, %v2770_v51  ;;  %s2825_s30 = sshll.u32 %s3426_s7, 4  ;;  %s2826_s30 = int_to_ptr.vmem [resolvable:$true] %s2825_s30 }
 0x36d   :  { %v2730_v37 = vmul.f32 %v3343_v21, %v2406_v41  ;;  %v2728_v20 = vmul.f32 %v4800_v9, %v2392_v42  ;;  %v2448_v12 = vadd.f32 %v2447_v7, %v2446_v17  ;;  %v2772_v36 = vsel %vm2753_vm6, %v2726_v3, %v2771_v26  ;;  %s3393_s18 = scalar_lea.vmem %s2826_s30, 128  ;;  %p3398_p11 = scmp.lt.s32.totalorder %s2826_s30, %s2826_s30 }
 0x36e   :  { %v3345_v2 = vpop.eup %3344  ;;  %v2805_v62 = vsel %vm2747_vm3, %v4802_v58, %v4801_v4  ;;  %p3394_p10 = scmp.ne.s32.totalorder %s2826_s30, %s3393_s18  ;;  %p3399_p12 = scmp.lt.s32.totalorder %s3393_s18, %s3393_s18 }
 0x36f   :  { %v3347_v0 = vpop.eup %3346  ;;  %v2734_v56 = vmul.f32 %v3345_v2, %v2434_v16  ;;  %v2773_v33 = vsel %vm2755_vm7, %v2730_v37, %v2772_v36  ;;  %v2806_v48 = vsel %vm2749_vm4, %v2720_v38, %v2805_v62 }
 0x370   :  { %v3349_v18 = vpop.eup %3348  ;;  %v2732_v35 = vmul.f32 %v3347_v0, %v2420_v34  ;;  %v2807_v23 = vsel %vm2751_vm5, %v2724_v22, %v2806_v48  ;;  %p3400_p13 = por %p3399_p12, %p3398_p11 }
 0x371   :  { %v3351_v59 = vpop.eup %3350  ;;  %v2774_v39 = vsel %vm2757_vm8, %v2734_v56, %v2773_v33  ;;  %v2736_v27 = vmul.f32 %v3349_v18, %v2448_v12  ;;  %v2808_v47 = vsel %vm2753_vm6, %v2728_v20, %v2807_v23 }
 0x372   :  { %2775 = vrot.lane.b32.xlu0 %v2774_v39, %s3425_s5  ;;  %v2733_v45 = vmul.f32 %v3351_v59, %v2427_v31  ;;  %v2809_v14 = vsel %vm2755_vm7, %v2732_v35, %v2808_v47  ;;  %p3401_p0 = pnand %p3400_p13, %p3394_p10 }
 0x373   :  { %v2810_v40 = vsel %vm2757_vm8, %v2736_v27, %v2809_v14 }
 0x374   :  { %v2758_v1 = vsel %vm2757_vm8, %v2733_v45, %v2756_v28 }
 0x376   :  { %2811 = vrot.lane.b32.xlu0 %v2810_v40, %s3423_s22 }
 0x3de   :  { %v2794_v8 = vpop.permute.xlu1 %2793 }
 0x3e4   :  { %v2776_v49 = vpop.permute.xlu0 %2775 }
 0x3e5   :  { %v2814_v17 = vsel %vm194_vm0, %v2758_v1, %v2776_v49 }
 0x3e6   :  { %v2815_v6 = vsel %vm491_vm1, %v2814_v17, %v2794_v8 }
 0x3e8   :  { %v2812_v53 = vpop.permute.xlu0 %2811 }
 0x3e9   :  { %v2817_v44 = vsel %vm2816_vm9, %v2815_v6, %v2812_v53 }
 0x3ea   :  { %2818 = vst [vmem:[#allocation7] sm:$0xff] %v2817_v44 }
 0x3eb   :  { %3404 = shalt.err (!%p3401_p0)
}
 0x3ec   :  { %2828 = dma.vmem_to_hbm [thread:$0]  %s2826_s30, 128, %s4726_s8, [#allocation4]  }
 0x3ed   :  { %3417 = dma.done.wait [#allocation4], 128  }
 0x3ee   :  { %3418 = vsyncadd [#allocation4], 4294967168 }
 0x3ef   :  { %2832 = vsyncpa [#allocation3], 1 }
 0x3f0   :  { %2833 = vsyncpa [#allocation6], 1 }
 0x3f1   :  { %2834 = vsyncpa [#allocation4], 1 }

</bundles_post_ra>
